<compile_context>
chip_gen: v7x
topology: tpu7x:2x2x1
jax: 0.10.0
libtpu: 0.0.40
codegen_flags: <defaults>
</compile_context>

<pallas_src>
import jax
import jax.numpy as jnp
from jax.experimental import pallas as pl
from jax.experimental.pallas import tpu as pltpu

_MIB = 1024 * 1024


def _samepad_kernel(x_ref, o_ref):
    # x_ref: (tile_r, T_in_block), o_ref: (tile_r, T_out).
    # Zero-offset static slice of the VMEM tile -> pure vld/vst copy stream.
    o_ref[...] = x_ref[:, : o_ref.shape[-1]]


def _target_block_bytes() -> int:
    """Per-chip input-block size target (v5e ~3 MiB, v6e ~6 MiB, v7x ~8 MiB)."""
    try:
        kind = jax.devices()[0].device_kind.lower()
    except Exception:
        return 4 * _MIB
    if "v5 lite" in kind or "v5e" in kind or "v5litepod" in kind:
        return 3 * _MIB
    if "v6" in kind:
        return 6 * _MIB
    if "v7" in kind:
        return 8 * _MIB
    return 4 * _MIB


def _choose_row_tiling(rows: int, row_in_bytes: int, sublane: int,
                       target_bytes: int):
    """Pick (tile_r, n_steps): dtype-aware sublane multiple, balanced steps."""
    tile_r = (target_bytes // max(1, row_in_bytes)) // sublane * sublane
    tile_r = max(sublane, tile_r)
    if tile_r >= rows:
        # Full-extent block: no (8,128) divisibility requirement, single step.
        return rows, 1
    n = pl.cdiv(rows, tile_r)
    if n % 2 == 1:
        n += 1  # even step count -> both v7x TensorCores get identical work
    # Rebalance so every step is (near-)equal instead of one runt step.
    tile_r = ((pl.cdiv(rows, n) + sublane - 1) // sublane) * sublane
    n = pl.cdiv(rows, tile_r)
    return tile_r, n


def same_pad(x: jax.Array, kernel_size: int, causal: bool = False) -> jax.Array:
    """Pallas implementation of SamePad.forward for x of shape (B, C, T)."""
    remove = (kernel_size - 1) if causal else (1 if kernel_size % 2 == 0 else 0)
    if remove <= 0:
        return x

    B, C, T = x.shape
    T_out = T - remove
    if T_out <= 0:
        # PyTorch x[:, :, :-remove] with remove >= T -> empty along time.
        return x[:, :, :0]

    rows = B * C
    itemsize = jnp.dtype(x.dtype).itemsize
    total_in_bytes = rows * T * itemsize

    # Small-input / narrow-time fallback: launch + pipeline overhead and lane
    # under-utilization dominate; a plain XLA slice (fusable into the consumer
    # conv) is strictly faster there.
    if total_in_bytes < _MIB or T_out < 128:
        return x[:, :, :T_out]

    x2d = x.reshape(rows, T)  # (B, C) -> rows: contiguous, free

    # If T_out is lane-aligned, skip DMAing the truncated tail columns.
    t_in_block = T_out if (T_out % 128 == 0) else T

    # Sub-32-bit dtypes pack along sublanes: f32 -> 8, bf16 -> 16, int8/fp8 -> 32.
    sublane = 8 * max(1, 4 // itemsize)
    tile_r, n_steps = _choose_row_tiling(
        rows, t_in_block * itemsize, sublane, _target_block_bytes())

    in_block_bytes = tile_r * t_in_block * itemsize
    out_block_bytes = tile_r * T_out * itemsize

    # Pathological tall-T case: a single sublane-group block would blow VMEM.
    if 2 * (in_block_bytes + out_block_bytes) > 48 * _MIB:
        return x[:, :, :T_out]

    # Double-buffered in+out blocks must fit the scoped VMEM window (+headroom).
    vmem_limit = min(48 * _MIB,
                     max(32 * _MIB, int(2.5 * (in_block_bytes + out_block_bytes))))

    out2d = pl.pallas_call(
        _samepad_kernel,
        out_shape=jax.ShapeDtypeStruct((rows, T_out), x.dtype),
        grid_spec=pltpu.PrefetchScalarGridSpec(
            num_scalar_prefetch=0,
            grid=(n_steps,),
            in_specs=[pl.BlockSpec((tile_r, t_in_block), lambda i: (i, 0))],
            out_specs=pl.BlockSpec((tile_r, T_out), lambda i: (i, 0)),
        ),
        compiler_params=pltpu.CompilerParams(
            dimension_semantics=("parallel",),   # no reduction; v7x uses both TCs
            vmem_limit_bytes=vmem_limit,
        ),
        cost_estimate=pl.CostEstimate(
            flops=0,
            transcendentals=0,
            bytes_accessed=rows * (t_in_block + T_out) * itemsize,
        ),
    )(x2d)

    return out2d.reshape(B, C, T_out)


if __name__ == "__main__":
    key = jax.random.PRNGKey(0)

    # Small shape consistent with the module (conv1d NCT layout): fallback path.
    B, C, T = 2, 4, 16
    x = jax.random.normal(key, (B, C, T), dtype=jnp.float32)

    y_even = same_pad(x, kernel_size=4, causal=False)       # remove = 1
    jax.block_until_ready(y_even)
    assert y_even.shape == (B, C, T - 1)
    assert jnp.allclose(y_even, x[:, :, :-1])

    y_causal = same_pad(x, kernel_size=3, causal=True)       # remove = 2
    jax.block_until_ready(y_causal)
    assert y_causal.shape == (B, C, T - 2)
    assert jnp.allclose(y_causal, x[:, :, :-2])

    y_odd = same_pad(x, kernel_size=3, causal=False)         # remove = 0
    jax.block_until_ready(y_odd)
    assert y_odd.shape == (B, C, T)
    assert jnp.allclose(y_odd, x)

    y_empty = same_pad(x, kernel_size=T + 4, causal=True)    # remove >= T
    jax.block_until_ready(y_empty)
    assert y_empty.shape == (B, C, 0)

    # Moderate f32 shape: exercises the row-tiled, lane-dense Pallas path
    # (T_out not 128-divisible -> full-width input block, in-kernel slice).
    B2, C2, T2 = 4, 512, 384
    x_big = jax.random.normal(jax.random.PRNGKey(1), (B2, C2, T2), jnp.float32)
    y_big = same_pad(x_big, kernel_size=4, causal=False)
    jax.block_until_ready(y_big)
    assert y_big.shape == (B2, C2, T2 - 1)
    assert jnp.allclose(y_big, x_big[:, :, :-1])

    # Causal mode with lane-aligned T_out: shrunk input block + balanced
    # multi-step (even) parallel grid.
    B3, C3, T3 = 8, 1024, 512
    x_c = jax.random.normal(jax.random.PRNGKey(2), (B3, C3, T3), jnp.float32)
    y_c = same_pad(x_c, kernel_size=129, causal=True)         # remove = 128
    jax.block_until_ready(y_c)
    assert y_c.shape == (B3, C3, T3 - 128)
    assert jnp.allclose(y_c, x_c[:, :, :-128])

    # bf16: dtype-aware sublane rounding (row tile multiple of 16).
    B4, C4, T4 = 2, 1024, 256
    x_bf16 = jax.random.normal(jax.random.PRNGKey(3), (B4, C4, T4),
                               jnp.float32).astype(jnp.bfloat16)
    y_bf16 = same_pad(x_bf16, kernel_size=4, causal=False)
    jax.block_until_ready(y_bf16)
    assert y_bf16.shape == (B4, C4, T4 - 1)
    assert jnp.array_equal(y_bf16, x_bf16[:, :, :-1])

    print("KERNEL_OK")
</pallas_src>

<mosaic_0001>
module attributes {stable_mosaic.version = 11 : i64} {
  func.func @_samepad_kernel(%arg0: i32, %arg1: memref<2048x384xf32, #tpu.memory_space<vmem>>, %arg2: memref<2048x383xf32, #tpu.memory_space<vmem>>) attributes {dimension_semantics = [#tpu.dimension_semantics<parallel>], iteration_bounds = array<i64: 1>, scalar_prefetch = 0 : i64, scratch_operands = 0 : i64, tpu.core_type = #tpu.core_type<tc>, window_params = [{transform_indices = @transform_0, window_bounds = array<i64: 2048, 384>}, {transform_indices = @transform_1, window_bounds = array<i64: 2048, 383>}]} {
    %c0 = arith.constant 0 : index
    %c0_0 = arith.constant 0 : index
    %0 = vector.load %arg1[%c0, %c0_0] : memref<2048x384xf32, #tpu.memory_space<vmem>>, vector<2048x383xf32>
    %c0_1 = arith.constant 0 : index
    %c0_2 = arith.constant 0 : index
    %1 = vector.load %arg2[%c0_1, %c0_2] : memref<2048x383xf32, #tpu.memory_space<vmem>>, vector<2048x383xf32>
    tpu.vector_store %arg2[%c0_1, %c0_2], %0 {strides = array<i32>} : memref<2048x383xf32, #tpu.memory_space<vmem>>, vector<2048x383xf32>,
    return
  }
  func.func @transform_0(%arg0: i32) -> (i32, i32) {
    %c0_i32 = arith.constant 0 : i32
    %c0_i32_0 = arith.constant 0 : i32
    return %arg0, %c0_i32 : i32, i32
  }
  func.func @transform_1(%arg0: i32) -> (i32, i32) {
    %c0_i32 = arith.constant 0 : i32
    %c0_i32_0 = arith.constant 0 : i32
    return %arg0, %c0_i32 : i32, i32
  }
}

</mosaic_0001>

<bundles_post_ra>
// kernel: tpu_custom_call.1
= control target key start
LH: loop header
LB: loop body
LE: loop exit
PB: predicated region body
PF: predicated region fallthrough
CT: control target
= control target key end

     0   :  { %6 = vsyncpa [#allocation3], 0  ;;  %s1929_s0 = inlined_call_operand.hbm [shape: f32[2048,384], index: 0, kind: input, shape index: {}]   ;;  %s1930_s1 = inlined_call_operand.hbm [shape: f32[2048,383], index: 1, kind: output, shape index: {}]  }
   0x1   :  { %7 = vsyncpa [#allocation4], 0  ;;  %s1629_s6 = smov [#allocation2]   ;;  %s1581_s10 = scalar_lea.hbm %s1929_s0, 98304 }
   0x2   :  { %s13_s7 = sshll.u32 %s1629_s6, 4  ;;  %p1582_p0 = scmp.ne.s32.totalorder %s1929_s0, %s1581_s10  ;;  %s14_s7 = int_to_ptr.vmem [resolvable:$true] %s13_s7 }
   0x3   :  { %p1585_p1 = scmp.lt.u32.totalorder %s1581_s10, %s1929_s0 }
   0x5   :  { %p1587_p2 = pnand %p1585_p1, %p1582_p0 }
   0x7   :  { %1590 = shalt.err (!%p1587_p2)
}
   0x8   :  { %s1591_s15 = scalar_lea.vmem %s14_s7, 98304  ;;  %p1596_p4 = scmp.lt.s32.totalorder %s14_s7, %s14_s7 }
   0x9   :  { %p1592_p3 = scmp.ne.s32.totalorder %s14_s7, %s1591_s15  ;;  %p1597_p5 = scmp.lt.s32.totalorder %s1591_s15, %s1591_s15 }
   0xb   :  { %p1598_p6 = por %p1597_p5, %p1596_p4 }
   0xd   :  { %p1599_p7 = pnand %p1598_p6, %p1592_p3 }
   0xf   :  { %1602 = shalt.err (!%p1599_p7)
}
  0x10   :  { %s1630_s16 = smov 384   ;;  %s1631_s17 = smov 24  }
  0x11   :  { %19 = dma.hbm_to_vmem [thread:$0]  %s1929_s0, 98304, %s14_s7, [#allocation3], %s1630_s16, %s1630_s16, %s1631_s17  }
  0x12   :  { %1625 = dma.done.wait [#allocation3], 98304  }
  0x13   :  { %1626 = vsyncadd [#allocation3], 4294868992  ;;  %vm793_vm0 = vcmask 1039360   ;;  %v23_v0 = vld [vmem:[#allocation2] sm:$0xff]  ;;  %v24_v1 = vld [vmem:[#allocation2 + $0x8] sm:$0xff]  ;;  %s1632_s0 = smov [#allocation5]  }
  0x14   :  { %v25_v2 = vld [vmem:[#allocation2 + $0x10] sm:$0xff]  ;;  %791 = vst [vmem:[#allocation5] sm:$0xff] %v23_v0  ;;  %792 = vst [vmem:[#allocation5 + $0x8] sm:$0xff] %v24_v1  ;;  %v26_v3 = vld [vmem:[#allocation2 + $0x18] sm:$0xff]  ;;  %s1565_s20 = sshll.u32 %s1632_s0, 4  ;;  %s1566_s20 = int_to_ptr.vmem [resolvable:$true] %s1565_s20 }
  0x15   :  { %794 = vst.msk [vmem:[#allocation5 + $0x10] sm:$0xff] %vm793_vm0, %v25_v2  ;;  %v27_v4 = vld [vmem:[#allocation2 + $0x20] sm:$0xff]  ;;  %v28_v5 = vld [vmem:[#allocation2 + $0x28] sm:$0xff]  ;;  %795 = vst [vmem:[#allocation5 + $0x18] sm:$0xff] %v26_v3  ;;  %s1603_s21 = scalar_lea.vmem %s1566_s20, 98304  ;;  %p1608_p9 = scmp.lt.s32.totalorder %s1566_s20, %s1566_s20 }
  0x16   :  { %796 = vst [vmem:[#allocation5 + $0x20] sm:$0xff] %v27_v4  ;;  %797 = vst.msk [vmem:[#allocation5 + $0x28] sm:$0xff] %vm793_vm0, %v28_v5  ;;  %v29_v6 = vld [vmem:[#allocation2 + $0x30] sm:$0xff]  ;;  %v30_v7 = vld [vmem:[#allocation2 + $0x38] sm:$0xff]  ;;  %p1604_p8 = scmp.ne.s32.totalorder %s1566_s20, %s1603_s21  ;;  %p1609_p10 = scmp.lt.s32.totalorder %s1603_s21, %s1603_s21 }
  0x17   :  { %v31_v8 = vld [vmem:[#allocation2 + $0x40] sm:$0xff]  ;;  %798 = vst [vmem:[#allocation5 + $0x30] sm:$0xff] %v29_v6  ;;  %799 = vst [vmem:[#allocation5 + $0x38] sm:$0xff] %v30_v7  ;;  %v32_v9 = vld [vmem:[#allocation2 + $0x48] sm:$0xff] }
  0x18   :  { %800 = vst.msk [vmem:[#allocation5 + $0x40] sm:$0xff] %vm793_vm0, %v31_v8  ;;  %v33_v10 = vld [vmem:[#allocation2 + $0x50] sm:$0xff]  ;;  %v34_v11 = vld [vmem:[#allocation2 + $0x58] sm:$0xff]  ;;  %801 = vst [vmem:[#allocation5 + $0x48] sm:$0xff] %v32_v9  ;;  %p1610_p11 = por %p1609_p10, %p1608_p9 }
  0x19   :  { %802 = vst [vmem:[#allocation5 + $0x50] sm:$0xff] %v33_v10  ;;  %803 = vst.msk [vmem:[#allocation5 + $0x58] sm:$0xff] %vm793_vm0, %v34_v11  ;;  %v35_v12 = vld [vmem:[#allocation2 + $0x60] sm:$0xff]  ;;  %v36_v13 = vld [vmem:[#allocation2 + $0x68] sm:$0xff] }
  0x1a   :  { %v37_v14 = vld [vmem:[#allocation2 + $0x70] sm:$0xff]  ;;  %804 = vst [vmem:[#allocation5 + $0x60] sm:$0xff] %v35_v12  ;;  %805 = vst [vmem:[#allocation5 + $0x68] sm:$0xff] %v36_v13  ;;  %v38_v15 = vld [vmem:[#allocation2 + $0x78] sm:$0xff]  ;;  %p1611_p12 = pnand %p1610_p11, %p1604_p8 }
  0x1b   :  { %806 = vst.msk [vmem:[#allocation5 + $0x70] sm:$0xff] %vm793_vm0, %v37_v14  ;;  %v39_v16 = vld [vmem:[#allocation2 + $0x80] sm:$0xff]  ;;  %v40_v17 = vld [vmem:[#allocation2 + $0x88] sm:$0xff]  ;;  %807 = vst [vmem:[#allocation5 + $0x78] sm:$0xff] %v38_v15 }
  0x1c   :  { %808 = vst [vmem:[#allocation5 + $0x80] sm:$0xff] %v39_v16  ;;  %809 = vst.msk [vmem:[#allocation5 + $0x88] sm:$0xff] %vm793_vm0, %v40_v17  ;;  %v41_v18 = vld [vmem:[#allocation2 + $0x90] sm:$0xff]  ;;  %v42_v19 = vld [vmem:[#allocation2 + $0x98] sm:$0xff] }
  0x1d   :  { %v43_v20 = vld [vmem:[#allocation2 + $0xa0] sm:$0xff]  ;;  %810 = vst [vmem:[#allocation5 + $0x90] sm:$0xff] %v41_v18  ;;  %811 = vst [vmem:[#allocation5 + $0x98] sm:$0xff] %v42_v19  ;;  %v44_v21 = vld [vmem:[#allocation2 + $0xa8] sm:$0xff] }
  0x1e   :  { %812 = vst.msk [vmem:[#allocation5 + $0xa0] sm:$0xff] %vm793_vm0, %v43_v20  ;;  %v45_v22 = vld [vmem:[#allocation2 + $0xb0] sm:$0xff]  ;;  %v46_v23 = vld [vmem:[#allocation2 + $0xb8] sm:$0xff]  ;;  %813 = vst [vmem:[#allocation5 + $0xa8] sm:$0xff] %v44_v21 }
  0x1f   :  { %814 = vst [vmem:[#allocation5 + $0xb0] sm:$0xff] %v45_v22  ;;  %815 = vst.msk [vmem:[#allocation5 + $0xb8] sm:$0xff] %vm793_vm0, %v46_v23  ;;  %v47_v24 = vld [vmem:[#allocation2 + $0xc0] sm:$0xff]  ;;  %v48_v25 = vld [vmem:[#allocation2 + $0xc8] sm:$0xff] }
  0x20   :  { %v49_v26 = vld [vmem:[#allocation2 + $0xd0] sm:$0xff]  ;;  %816 = vst [vmem:[#allocation5 + $0xc0] sm:$0xff] %v47_v24  ;;  %817 = vst [vmem:[#allocation5 + $0xc8] sm:$0xff] %v48_v25  ;;  %v50_v27 = vld [vmem:[#allocation2 + $0xd8] sm:$0xff] }
  0x21   :  { %818 = vst.msk [vmem:[#allocation5 + $0xd0] sm:$0xff] %vm793_vm0, %v49_v26  ;;  %v51_v28 = vld [vmem:[#allocation2 + $0xe0] sm:$0xff]  ;;  %v52_v29 = vld [vmem:[#allocation2 + $0xe8] sm:$0xff]  ;;  %819 = vst [vmem:[#allocation5 + $0xd8] sm:$0xff] %v50_v27 }
  0x22   :  { %820 = vst [vmem:[#allocation5 + $0xe0] sm:$0xff] %v51_v28  ;;  %821 = vst.msk [vmem:[#allocation5 + $0xe8] sm:$0xff] %vm793_vm0, %v52_v29  ;;  %v53_v30 = vld [vmem:[#allocation2 + $0xf0] sm:$0xff]  ;;  %v54_v31 = vld [vmem:[#allocation2 + $0xf8] sm:$0xff] }
  0x23   :  { %v55_v32 = vld [vmem:[#allocation2 + $0x100] sm:$0xff]  ;;  %822 = vst [vmem:[#allocation5 + $0xf0] sm:$0xff] %v53_v30  ;;  %823 = vst [vmem:[#allocation5 + $0xf8] sm:$0xff] %v54_v31  ;;  %v56_v33 = vld [vmem:[#allocation2 + $0x108] sm:$0xff] }
  0x24   :  { %824 = vst.msk [vmem:[#allocation5 + $0x100] sm:$0xff] %vm793_vm0, %v55_v32  ;;  %v57_v34 = vld [vmem:[#allocation2 + $0x110] sm:$0xff]  ;;  %v58_v35 = vld [vmem:[#allocation2 + $0x118] sm:$0xff]  ;;  %825 = vst [vmem:[#allocation5 + $0x108] sm:$0xff] %v56_v33 }
  0x25   :  { %826 = vst [vmem:[#allocation5 + $0x110] sm:$0xff] %v57_v34  ;;  %827 = vst.msk [vmem:[#allocation5 + $0x118] sm:$0xff] %vm793_vm0, %v58_v35  ;;  %v59_v36 = vld [vmem:[#allocation2 + $0x120] sm:$0xff]  ;;  %v60_v37 = vld [vmem:[#allocation2 + $0x128] sm:$0xff] }
  0x26   :  { %v61_v38 = vld [vmem:[#allocation2 + $0x130] sm:$0xff]  ;;  %828 = vst [vmem:[#allocation5 + $0x120] sm:$0xff] %v59_v36  ;;  %829 = vst [vmem:[#allocation5 + $0x128] sm:$0xff] %v60_v37  ;;  %v62_v39 = vld [vmem:[#allocation2 + $0x138] sm:$0xff] }
  0x27   :  { %830 = vst.msk [vmem:[#allocation5 + $0x130] sm:$0xff] %vm793_vm0, %v61_v38  ;;  %v63_v40 = vld [vmem:[#allocation2 + $0x140] sm:$0xff]  ;;  %v64_v41 = vld [vmem:[#allocation2 + $0x148] sm:$0xff]  ;;  %831 = vst [vmem:[#allocation5 + $0x138] sm:$0xff] %v62_v39 }
  0x28   :  { %832 = vst [vmem:[#allocation5 + $0x140] sm:$0xff] %v63_v40  ;;  %833 = vst.msk [vmem:[#allocation5 + $0x148] sm:$0xff] %vm793_vm0, %v64_v41  ;;  %v65_v42 = vld [vmem:[#allocation2 + $0x150] sm:$0xff]  ;;  %v66_v43 = vld [vmem:[#allocation2 + $0x158] sm:$0xff] }
  0x29   :  { %v67_v44 = vld [vmem:[#allocation2 + $0x160] sm:$0xff]  ;;  %834 = vst [vmem:[#allocation5 + $0x150] sm:$0xff] %v65_v42  ;;  %835 = vst [vmem:[#allocation5 + $0x158] sm:$0xff] %v66_v43  ;;  %v68_v45 = vld [vmem:[#allocation2 + $0x168] sm:$0xff] }
  0x2a   :  { %836 = vst.msk [vmem:[#allocation5 + $0x160] sm:$0xff] %vm793_vm0, %v67_v44  ;;  %v69_v46 = vld [vmem:[#allocation2 + $0x170] sm:$0xff]  ;;  %v70_v47 = vld [vmem:[#allocation2 + $0x178] sm:$0xff]  ;;  %837 = vst [vmem:[#allocation5 + $0x168] sm:$0xff] %v68_v45 }
  0x2b   :  { %838 = vst [vmem:[#allocation5 + $0x170] sm:$0xff] %v69_v46  ;;  %839 = vst.msk [vmem:[#allocation5 + $0x178] sm:$0xff] %vm793_vm0, %v70_v47  ;;  %v71_v48 = vld [vmem:[#allocation2 + $0x180] sm:$0xff]  ;;  %v72_v49 = vld [vmem:[#allocation2 + $0x188] sm:$0xff] }
  0x2c   :  { %v73_v50 = vld [vmem:[#allocation2 + $0x190] sm:$0xff]  ;;  %840 = vst [vmem:[#allocation5 + $0x180] sm:$0xff] %v71_v48  ;;  %841 = vst [vmem:[#allocation5 + $0x188] sm:$0xff] %v72_v49  ;;  %v74_v51 = vld [vmem:[#allocation2 + $0x198] sm:$0xff] }
  0x2d   :  { %842 = vst.msk [vmem:[#allocation5 + $0x190] sm:$0xff] %vm793_vm0, %v73_v50  ;;  %v75_v52 = vld [vmem:[#allocation2 + $0x1a0] sm:$0xff]  ;;  %v76_v53 = vld [vmem:[#allocation2 + $0x1a8] sm:$0xff]  ;;  %843 = vst [vmem:[#allocation5 + $0x198] sm:$0xff] %v74_v51 }
  0x2e   :  { %844 = vst [vmem:[#allocation5 + $0x1a0] sm:$0xff] %v75_v52  ;;  %845 = vst.msk [vmem:[#allocation5 + $0x1a8] sm:$0xff] %vm793_vm0, %v76_v53  ;;  %v77_v54 = vld [vmem:[#allocation2 + $0x1b0] sm:$0xff]  ;;  %v78_v55 = vld [vmem:[#allocation2 + $0x1b8] sm:$0xff] }
  0x2f   :  { %v79_v56 = vld [vmem:[#allocation2 + $0x1c0] sm:$0xff]  ;;  %846 = vst [vmem:[#allocation5 + $0x1b0] sm:$0xff] %v77_v54  ;;  %847 = vst [vmem:[#allocation5 + $0x1b8] sm:$0xff] %v78_v55  ;;  %v80_v57 = vld [vmem:[#allocation2 + $0x1c8] sm:$0xff] }
  0x30   :  { %848 = vst.msk [vmem:[#allocation5 + $0x1c0] sm:$0xff] %vm793_vm0, %v79_v56  ;;  %v81_v58 = vld [vmem:[#allocation2 + $0x1d0] sm:$0xff]  ;;  %v82_v59 = vld [vmem:[#allocation2 + $0x1d8] sm:$0xff]  ;;  %849 = vst [vmem:[#allocation5 + $0x1c8] sm:$0xff] %v80_v57 }
  0x31   :  { %850 = vst [vmem:[#allocation5 + $0x1d0] sm:$0xff] %v81_v58  ;;  %851 = vst.msk [vmem:[#allocation5 + $0x1d8] sm:$0xff] %vm793_vm0, %v82_v59  ;;  %v83_v60 = vld [vmem:[#allocation2 + $0x1e0] sm:$0xff]  ;;  %v84_v61 = vld [vmem:[#allocation2 + $0x1e8] sm:$0xff] }
  0x32   :  { %v85_v62 = vld [vmem:[#allocation2 + $0x1f0] sm:$0xff]  ;;  %852 = vst [vmem:[#allocation5 + $0x1e0] sm:$0xff] %v83_v60  ;;  %853 = vst [vmem:[#allocation5 + $0x1e8] sm:$0xff] %v84_v61  ;;  %v86_v63 = vld [vmem:[#allocation2 + $0x1f8] sm:$0xff] }
  0x33   :  { %854 = vst.msk [vmem:[#allocation5 + $0x1f0] sm:$0xff] %vm793_vm0, %v85_v62  ;;  %v87_v0 = vld [vmem:[#allocation2 + $0x200] sm:$0xff]  ;;  %v88_v1 = vld [vmem:[#allocation2 + $0x208] sm:$0xff]  ;;  %855 = vst [vmem:[#allocation5 + $0x1f8] sm:$0xff] %v86_v63 }
  0x34   :  { %856 = vst [vmem:[#allocation5 + $0x200] sm:$0xff] %v87_v0  ;;  %857 = vst.msk [vmem:[#allocation5 + $0x208] sm:$0xff] %vm793_vm0, %v88_v1  ;;  %v89_v2 = vld [vmem:[#allocation2 + $0x210] sm:$0xff]  ;;  %v90_v3 = vld [vmem:[#allocation2 + $0x218] sm:$0xff] }
  0x35   :  { %v91_v4 = vld [vmem:[#allocation2 + $0x220] sm:$0xff]  ;;  %858 = vst [vmem:[#allocation5 + $0x210] sm:$0xff] %v89_v2  ;;  %859 = vst [vmem:[#allocation5 + $0x218] sm:$0xff] %v90_v3  ;;  %v92_v5 = vld [vmem:[#allocation2 + $0x228] sm:$0xff] }
  0x36   :  { %860 = vst.msk [vmem:[#allocation5 + $0x220] sm:$0xff] %vm793_vm0, %v91_v4  ;;  %v93_v6 = vld [vmem:[#allocation2 + $0x230] sm:$0xff]  ;;  %v94_v7 = vld [vmem:[#allocation2 + $0x238] sm:$0xff]  ;;  %861 = vst [vmem:[#allocation5 + $0x228] sm:$0xff] %v92_v5 }
  0x37   :  { %862 = vst [vmem:[#allocation5 + $0x230] sm:$0xff] %v93_v6  ;;  %863 = vst.msk [vmem:[#allocation5 + $0x238] sm:$0xff] %vm793_vm0, %v94_v7  ;;  %v95_v8 = vld [vmem:[#allocation2 + $0x240] sm:$0xff]  ;;  %v96_v9 = vld [vmem:[#allocation2 + $0x248] sm:$0xff] }
  0x38   :  { %v97_v10 = vld [vmem:[#allocation2 + $0x250] sm:$0xff]  ;;  %864 = vst [vmem:[#allocation5 + $0x240] sm:$0xff] %v95_v8  ;;  %865 = vst [vmem:[#allocation5 + $0x248] sm:$0xff] %v96_v9  ;;  %v98_v11 = vld [vmem:[#allocation2 + $0x258] sm:$0xff] }
  0x39   :  { %866 = vst.msk [vmem:[#allocation5 + $0x250] sm:$0xff] %vm793_vm0, %v97_v10  ;;  %v99_v12 = vld [vmem:[#allocation2 + $0x260] sm:$0xff]  ;;  %v100_v13 = vld [vmem:[#allocation2 + $0x268] sm:$0xff]  ;;  %867 = vst [vmem:[#allocation5 + $0x258] sm:$0xff] %v98_v11 }
  0x3a   :  { %868 = vst [vmem:[#allocation5 + $0x260] sm:$0xff] %v99_v12  ;;  %869 = vst.msk [vmem:[#allocation5 + $0x268] sm:$0xff] %vm793_vm0, %v100_v13  ;;  %v101_v14 = vld [vmem:[#allocation2 + $0x270] sm:$0xff]  ;;  %v102_v15 = vld [vmem:[#allocation2 + $0x278] sm:$0xff] }
  0x3b   :  { %v103_v16 = vld [vmem:[#allocation2 + $0x280] sm:$0xff]  ;;  %870 = vst [vmem:[#allocation5 + $0x270] sm:$0xff] %v101_v14  ;;  %871 = vst [vmem:[#allocation5 + $0x278] sm:$0xff] %v102_v15  ;;  %v104_v17 = vld [vmem:[#allocation2 + $0x288] sm:$0xff] }
  0x3c   :  { %872 = vst.msk [vmem:[#allocation5 + $0x280] sm:$0xff] %vm793_vm0, %v103_v16  ;;  %v105_v18 = vld [vmem:[#allocation2 + $0x290] sm:$0xff]  ;;  %v106_v19 = vld [vmem:[#allocation2 + $0x298] sm:$0xff]  ;;  %873 = vst [vmem:[#allocation5 + $0x288] sm:$0xff] %v104_v17 }
  0x3d   :  { %874 = vst [vmem:[#allocation5 + $0x290] sm:$0xff] %v105_v18  ;;  %875 = vst.msk [vmem:[#allocation5 + $0x298] sm:$0xff] %vm793_vm0, %v106_v19  ;;  %v107_v20 = vld [vmem:[#allocation2 + $0x2a0] sm:$0xff]  ;;  %v108_v21 = vld [vmem:[#allocation2 + $0x2a8] sm:$0xff] }
  0x3e   :  { %v109_v22 = vld [vmem:[#allocation2 + $0x2b0] sm:$0xff]  ;;  %876 = vst [vmem:[#allocation5 + $0x2a0] sm:$0xff] %v107_v20  ;;  %877 = vst [vmem:[#allocation5 + $0x2a8] sm:$0xff] %v108_v21  ;;  %v110_v23 = vld [vmem:[#allocation2 + $0x2b8] sm:$0xff] }
  0x3f   :  { %878 = vst.msk [vmem:[#allocation5 + $0x2b0] sm:$0xff] %vm793_vm0, %v109_v22  ;;  %v111_v24 = vld [vmem:[#allocation2 + $0x2c0] sm:$0xff]  ;;  %v112_v25 = vld [vmem:[#allocation2 + $0x2c8] sm:$0xff]  ;;  %879 = vst [vmem:[#allocation5 + $0x2b8] sm:$0xff] %v110_v23 }
  0x40   :  { %880 = vst [vmem:[#allocation5 + $0x2c0] sm:$0xff] %v111_v24  ;;  %881 = vst.msk [vmem:[#allocation5 + $0x2c8] sm:$0xff] %vm793_vm0, %v112_v25  ;;  %v113_v26 = vld [vmem:[#allocation2 + $0x2d0] sm:$0xff]  ;;  %v114_v27 = vld [vmem:[#allocation2 + $0x2d8] sm:$0xff] }
  0x41   :  { %v115_v28 = vld [vmem:[#allocation2 + $0x2e0] sm:$0xff]  ;;  %882 = vst [vmem:[#allocation5 + $0x2d0] sm:$0xff] %v113_v26  ;;  %883 = vst [vmem:[#allocation5 + $0x2d8] sm:$0xff] %v114_v27  ;;  %v116_v29 = vld [vmem:[#allocation2 + $0x2e8] sm:$0xff] }
  0x42   :  { %884 = vst.msk [vmem:[#allocation5 + $0x2e0] sm:$0xff] %vm793_vm0, %v115_v28  ;;  %v117_v30 = vld [vmem:[#allocation2 + $0x2f0] sm:$0xff]  ;;  %v118_v31 = vld [vmem:[#allocation2 + $0x2f8] sm:$0xff]  ;;  %885 = vst [vmem:[#allocation5 + $0x2e8] sm:$0xff] %v116_v29 }
  0x43   :  { %886 = vst [vmem:[#allocation5 + $0x2f0] sm:$0xff] %v117_v30  ;;  %887 = vst.msk [vmem:[#allocation5 + $0x2f8] sm:$0xff] %vm793_vm0, %v118_v31  ;;  %v119_v32 = vld [vmem:[#allocation2 + $0x300] sm:$0xff]  ;;  %v120_v33 = vld [vmem:[#allocation2 + $0x308] sm:$0xff] }
  0x44   :  { %v121_v34 = vld [vmem:[#allocation2 + $0x310] sm:$0xff]  ;;  %888 = vst [vmem:[#allocation5 + $0x300] sm:$0xff] %v119_v32  ;;  %889 = vst [vmem:[#allocation5 + $0x308] sm:$0xff] %v120_v33  ;;  %v122_v35 = vld [vmem:[#allocation2 + $0x318] sm:$0xff] }
  0x45   :  { %890 = vst.msk [vmem:[#allocation5 + $0x310] sm:$0xff] %vm793_vm0, %v121_v34  ;;  %v123_v36 = vld [vmem:[#allocation2 + $0x320] sm:$0xff]  ;;  %v124_v37 = vld [vmem:[#allocation2 + $0x328] sm:$0xff]  ;;  %891 = vst [vmem:[#allocation5 + $0x318] sm:$0xff] %v122_v35 }
  0x46   :  { %892 = vst [vmem:[#allocation5 + $0x320] sm:$0xff] %v123_v36  ;;  %893 = vst.msk [vmem:[#allocation5 + $0x328] sm:$0xff] %vm793_vm0, %v124_v37  ;;  %v125_v38 = vld [vmem:[#allocation2 + $0x330] sm:$0xff]  ;;  %v126_v39 = vld [vmem:[#allocation2 + $0x338] sm:$0xff] }
  0x47   :  { %v127_v40 = vld [vmem:[#allocation2 + $0x340] sm:$0xff]  ;;  %894 = vst [vmem:[#allocation5 + $0x330] sm:$0xff] %v125_v38  ;;  %895 = vst [vmem:[#allocation5 + $0x338] sm:$0xff] %v126_v39  ;;  %v128_v41 = vld [vmem:[#allocation2 + $0x348] sm:$0xff] }
  0x48   :  { %896 = vst.msk [vmem:[#allocation5 + $0x340] sm:$0xff] %vm793_vm0, %v127_v40  ;;  %v129_v42 = vld [vmem:[#allocation2 + $0x350] sm:$0xff]  ;;  %v130_v43 = vld [vmem:[#allocation2 + $0x358] sm:$0xff]  ;;  %897 = vst [vmem:[#allocation5 + $0x348] sm:$0xff] %v128_v41 }
  0x49   :  { %898 = vst [vmem:[#allocation5 + $0x350] sm:$0xff] %v129_v42  ;;  %899 = vst.msk [vmem:[#allocation5 + $0x358] sm:$0xff] %vm793_vm0, %v130_v43  ;;  %v131_v44 = vld [vmem:[#allocation2 + $0x360] sm:$0xff]  ;;  %v132_v45 = vld [vmem:[#allocation2 + $0x368] sm:$0xff] }
  0x4a   :  { %v133_v46 = vld [vmem:[#allocation2 + $0x370] sm:$0xff]  ;;  %900 = vst [vmem:[#allocation5 + $0x360] sm:$0xff] %v131_v44  ;;  %901 = vst [vmem:[#allocation5 + $0x368] sm:$0xff] %v132_v45  ;;  %v134_v47 = vld [vmem:[#allocation2 + $0x378] sm:$0xff] }
  0x4b   :  { %902 = vst.msk [vmem:[#allocation5 + $0x370] sm:$0xff] %vm793_vm0, %v133_v46  ;;  %v135_v48 = vld [vmem:[#allocation2 + $0x380] sm:$0xff]  ;;  %v136_v49 = vld [vmem:[#allocation2 + $0x388] sm:$0xff]  ;;  %903 = vst [vmem:[#allocation5 + $0x378] sm:$0xff] %v134_v47 }
  0x4c   :  { %904 = vst [vmem:[#allocation5 + $0x380] sm:$0xff] %v135_v48  ;;  %905 = vst.msk [vmem:[#allocation5 + $0x388] sm:$0xff] %vm793_vm0, %v136_v49  ;;  %v137_v50 = vld [vmem:[#allocation2 + $0x390] sm:$0xff]  ;;  %v138_v51 = vld [vmem:[#allocation2 + $0x398] sm:$0xff] }
  0x4d   :  { %v139_v52 = vld [vmem:[#allocation2 + $0x3a0] sm:$0xff]  ;;  %906 = vst [vmem:[#allocation5 + $0x390] sm:$0xff] %v137_v50  ;;  %907 = vst [vmem:[#allocation5 + $0x398] sm:$0xff] %v138_v51  ;;  %v140_v53 = vld [vmem:[#allocation2 + $0x3a8] sm:$0xff] }
  0x4e   :  { %908 = vst.msk [vmem:[#allocation5 + $0x3a0] sm:$0xff] %vm793_vm0, %v139_v52  ;;  %v141_v54 = vld [vmem:[#allocation2 + $0x3b0] sm:$0xff]  ;;  %v142_v55 = vld [vmem:[#allocation2 + $0x3b8] sm:$0xff]  ;;  %909 = vst [vmem:[#allocation5 + $0x3a8] sm:$0xff] %v140_v53 }
  0x4f   :  { %910 = vst [vmem:[#allocation5 + $0x3b0] sm:$0xff] %v141_v54  ;;  %911 = vst.msk [vmem:[#allocation5 + $0x3b8] sm:$0xff] %vm793_vm0, %v142_v55  ;;  %v143_v56 = vld [vmem:[#allocation2 + $0x3c0] sm:$0xff]  ;;  %v144_v57 = vld [vmem:[#allocation2 + $0x3c8] sm:$0xff] }
  0x50   :  { %v145_v58 = vld [vmem:[#allocation2 + $0x3d0] sm:$0xff]  ;;  %912 = vst [vmem:[#allocation5 + $0x3c0] sm:$0xff] %v143_v56  ;;  %913 = vst [vmem:[#allocation5 + $0x3c8] sm:$0xff] %v144_v57  ;;  %v146_v59 = vld [vmem:[#allocation2 + $0x3d8] sm:$0xff] }
  0x51   :  { %914 = vst.msk [vmem:[#allocation5 + $0x3d0] sm:$0xff] %vm793_vm0, %v145_v58  ;;  %v147_v60 = vld [vmem:[#allocation2 + $0x3e0] sm:$0xff]  ;;  %v148_v61 = vld [vmem:[#allocation2 + $0x3e8] sm:$0xff]  ;;  %915 = vst [vmem:[#allocation5 + $0x3d8] sm:$0xff] %v146_v59 }
  0x52   :  { %916 = vst [vmem:[#allocation5 + $0x3e0] sm:$0xff] %v147_v60  ;;  %917 = vst.msk [vmem:[#allocation5 + $0x3e8] sm:$0xff] %vm793_vm0, %v148_v61  ;;  %v149_v62 = vld [vmem:[#allocation2 + $0x3f0] sm:$0xff]  ;;  %v150_v63 = vld [vmem:[#allocation2 + $0x3f8] sm:$0xff] }
  0x53   :  { %v151_v0 = vld [vmem:[#allocation2 + $0x400] sm:$0xff]  ;;  %918 = vst [vmem:[#allocation5 + $0x3f0] sm:$0xff] %v149_v62  ;;  %919 = vst [vmem:[#allocation5 + $0x3f8] sm:$0xff] %v150_v63  ;;  %v152_v1 = vld [vmem:[#allocation2 + $0x408] sm:$0xff] }
  0x54   :  { %920 = vst.msk [vmem:[#allocation5 + $0x400] sm:$0xff] %vm793_vm0, %v151_v0  ;;  %v153_v2 = vld [vmem:[#allocation2 + $0x410] sm:$0xff]  ;;  %v154_v3 = vld [vmem:[#allocation2 + $0x418] sm:$0xff]  ;;  %921 = vst [vmem:[#allocation5 + $0x408] sm:$0xff] %v152_v1 }
  0x55   :  { %922 = vst [vmem:[#allocation5 + $0x410] sm:$0xff] %v153_v2  ;;  %923 = vst.msk [vmem:[#allocation5 + $0x418] sm:$0xff] %vm793_vm0, %v154_v3  ;;  %v155_v4 = vld [vmem:[#allocation2 + $0x420] sm:$0xff]  ;;  %v156_v5 = vld [vmem:[#allocation2 + $0x428] sm:$0xff] }
  0x56   :  { %v157_v6 = vld [vmem:[#allocation2 + $0x430] sm:$0xff]  ;;  %924 = vst [vmem:[#allocation5 + $0x420] sm:$0xff] %v155_v4  ;;  %925 = vst [vmem:[#allocation5 + $0x428] sm:$0xff] %v156_v5  ;;  %v158_v7 = vld [vmem:[#allocation2 + $0x438] sm:$0xff] }
  0x57   :  { %926 = vst.msk [vmem:[#allocation5 + $0x430] sm:$0xff] %vm793_vm0, %v157_v6  ;;  %v159_v8 = vld [vmem:[#allocation2 + $0x440] sm:$0xff]  ;;  %v160_v9 = vld [vmem:[#allocation2 + $0x448] sm:$0xff]  ;;  %927 = vst [vmem:[#allocation5 + $0x438] sm:$0xff] %v158_v7 }
  0x58   :  { %928 = vst [vmem:[#allocation5 + $0x440] sm:$0xff] %v159_v8  ;;  %929 = vst.msk [vmem:[#allocation5 + $0x448] sm:$0xff] %vm793_vm0, %v160_v9  ;;  %v161_v10 = vld [vmem:[#allocation2 + $0x450] sm:$0xff]  ;;  %v162_v11 = vld [vmem:[#allocation2 + $0x458] sm:$0xff] }
  0x59   :  { %v163_v12 = vld [vmem:[#allocation2 + $0x460] sm:$0xff]  ;;  %930 = vst [vmem:[#allocation5 + $0x450] sm:$0xff] %v161_v10  ;;  %931 = vst [vmem:[#allocation5 + $0x458] sm:$0xff] %v162_v11  ;;  %v164_v13 = vld [vmem:[#allocation2 + $0x468] sm:$0xff] }
  0x5a   :  { %932 = vst.msk [vmem:[#allocation5 + $0x460] sm:$0xff] %vm793_vm0, %v163_v12  ;;  %v165_v14 = vld [vmem:[#allocation2 + $0x470] sm:$0xff]  ;;  %v166_v15 = vld [vmem:[#allocation2 + $0x478] sm:$0xff]  ;;  %933 = vst [vmem:[#allocation5 + $0x468] sm:$0xff] %v164_v13 }
  0x5b   :  { %934 = vst [vmem:[#allocation5 + $0x470] sm:$0xff] %v165_v14  ;;  %935 = vst.msk [vmem:[#allocation5 + $0x478] sm:$0xff] %vm793_vm0, %v166_v15  ;;  %v167_v16 = vld [vmem:[#allocation2 + $0x480] sm:$0xff]  ;;  %v168_v17 = vld [vmem:[#allocation2 + $0x488] sm:$0xff] }
  0x5c   :  { %v169_v18 = vld [vmem:[#allocation2 + $0x490] sm:$0xff]  ;;  %936 = vst [vmem:[#allocation5 + $0x480] sm:$0xff] %v167_v16  ;;  %937 = vst [vmem:[#allocation5 + $0x488] sm:$0xff] %v168_v17  ;;  %v170_v19 = vld [vmem:[#allocation2 + $0x498] sm:$0xff] }
  0x5d   :  { %938 = vst.msk [vmem:[#allocation5 + $0x490] sm:$0xff] %vm793_vm0, %v169_v18  ;;  %v171_v20 = vld [vmem:[#allocation2 + $0x4a0] sm:$0xff]  ;;  %v172_v21 = vld [vmem:[#allocation2 + $0x4a8] sm:$0xff]  ;;  %939 = vst [vmem:[#allocation5 + $0x498] sm:$0xff] %v170_v19 }
  0x5e   :  { %940 = vst [vmem:[#allocation5 + $0x4a0] sm:$0xff] %v171_v20  ;;  %941 = vst.msk [vmem:[#allocation5 + $0x4a8] sm:$0xff] %vm793_vm0, %v172_v21  ;;  %v173_v22 = vld [vmem:[#allocation2 + $0x4b0] sm:$0xff]  ;;  %v174_v23 = vld [vmem:[#allocation2 + $0x4b8] sm:$0xff] }
  0x5f   :  { %v175_v24 = vld [vmem:[#allocation2 + $0x4c0] sm:$0xff]  ;;  %942 = vst [vmem:[#allocation5 + $0x4b0] sm:$0xff] %v173_v22  ;;  %943 = vst [vmem:[#allocation5 + $0x4b8] sm:$0xff] %v174_v23  ;;  %v176_v25 = vld [vmem:[#allocation2 + $0x4c8] sm:$0xff] }
  0x60   :  { %944 = vst.msk [vmem:[#allocation5 + $0x4c0] sm:$0xff] %vm793_vm0, %v175_v24  ;;  %v177_v26 = vld [vmem:[#allocation2 + $0x4d0] sm:$0xff]  ;;  %v178_v27 = vld [vmem:[#allocation2 + $0x4d8] sm:$0xff]  ;;  %945 = vst [vmem:[#allocation5 + $0x4c8] sm:$0xff] %v176_v25 }
  0x61   :  { %946 = vst [vmem:[#allocation5 + $0x4d0] sm:$0xff] %v177_v26  ;;  %947 = vst.msk [vmem:[#allocation5 + $0x4d8] sm:$0xff] %vm793_vm0, %v178_v27  ;;  %v179_v28 = vld [vmem:[#allocation2 + $0x4e0] sm:$0xff]  ;;  %v180_v29 = vld [vmem:[#allocation2 + $0x4e8] sm:$0xff] }
  0x62   :  { %v181_v30 = vld [vmem:[#allocation2 + $0x4f0] sm:$0xff]  ;;  %948 = vst [vmem:[#allocation5 + $0x4e0] sm:$0xff] %v179_v28  ;;  %949 = vst [vmem:[#allocation5 + $0x4e8] sm:$0xff] %v180_v29  ;;  %v182_v31 = vld [vmem:[#allocation2 + $0x4f8] sm:$0xff] }
  0x63   :  { %950 = vst.msk [vmem:[#allocation5 + $0x4f0] sm:$0xff] %vm793_vm0, %v181_v30  ;;  %v183_v32 = vld [vmem:[#allocation2 + $0x500] sm:$0xff]  ;;  %v184_v33 = vld [vmem:[#allocation2 + $0x508] sm:$0xff]  ;;  %951 = vst [vmem:[#allocation5 + $0x4f8] sm:$0xff] %v182_v31 }
  0x64   :  { %952 = vst [vmem:[#allocation5 + $0x500] sm:$0xff] %v183_v32  ;;  %953 = vst.msk [vmem:[#allocation5 + $0x508] sm:$0xff] %vm793_vm0, %v184_v33  ;;  %v185_v34 = vld [vmem:[#allocation2 + $0x510] sm:$0xff]  ;;  %v186_v35 = vld [vmem:[#allocation2 + $0x518] sm:$0xff] }
  0x65   :  { %v187_v36 = vld [vmem:[#allocation2 + $0x520] sm:$0xff]  ;;  %954 = vst [vmem:[#allocation5 + $0x510] sm:$0xff] %v185_v34  ;;  %955 = vst [vmem:[#allocation5 + $0x518] sm:$0xff] %v186_v35  ;;  %v188_v37 = vld [vmem:[#allocation2 + $0x528] sm:$0xff] }
  0x66   :  { %956 = vst.msk [vmem:[#allocation5 + $0x520] sm:$0xff] %vm793_vm0, %v187_v36  ;;  %v189_v38 = vld [vmem:[#allocation2 + $0x530] sm:$0xff]  ;;  %v190_v39 = vld [vmem:[#allocation2 + $0x538] sm:$0xff]  ;;  %957 = vst [vmem:[#allocation5 + $0x528] sm:$0xff] %v188_v37 }
  0x67   :  { %958 = vst [vmem:[#allocation5 + $0x530] sm:$0xff] %v189_v38  ;;  %959 = vst.msk [vmem:[#allocation5 + $0x538] sm:$0xff] %vm793_vm0, %v190_v39  ;;  %v191_v40 = vld [vmem:[#allocation2 + $0x540] sm:$0xff]  ;;  %v192_v41 = vld [vmem:[#allocation2 + $0x548] sm:$0xff] }
  0x68   :  { %v193_v42 = vld [vmem:[#allocation2 + $0x550] sm:$0xff]  ;;  %960 = vst [vmem:[#allocation5 + $0x540] sm:$0xff] %v191_v40  ;;  %961 = vst [vmem:[#allocation5 + $0x548] sm:$0xff] %v192_v41  ;;  %v194_v43 = vld [vmem:[#allocation2 + $0x558] sm:$0xff] }
  0x69   :  { %962 = vst.msk [vmem:[#allocation5 + $0x550] sm:$0xff] %vm793_vm0, %v193_v42  ;;  %v195_v44 = vld [vmem:[#allocation2 + $0x560] sm:$0xff]  ;;  %v196_v45 = vld [vmem:[#allocation2 + $0x568] sm:$0xff]  ;;  %963 = vst [vmem:[#allocation5 + $0x558] sm:$0xff] %v194_v43 }
  0x6a   :  { %964 = vst [vmem:[#allocation5 + $0x560] sm:$0xff] %v195_v44  ;;  %965 = vst.msk [vmem:[#allocation5 + $0x568] sm:$0xff] %vm793_vm0, %v196_v45  ;;  %v197_v46 = vld [vmem:[#allocation2 + $0x570] sm:$0xff]  ;;  %v198_v47 = vld [vmem:[#allocation2 + $0x578] sm:$0xff] }
  0x6b   :  { %v199_v48 = vld [vmem:[#allocation2 + $0x580] sm:$0xff]  ;;  %966 = vst [vmem:[#allocation5 + $0x570] sm:$0xff] %v197_v46  ;;  %967 = vst [vmem:[#allocation5 + $0x578] sm:$0xff] %v198_v47  ;;  %v200_v49 = vld [vmem:[#allocation2 + $0x588] sm:$0xff] }
  0x6c   :  { %968 = vst.msk [vmem:[#allocation5 + $0x580] sm:$0xff] %vm793_vm0, %v199_v48  ;;  %v201_v50 = vld [vmem:[#allocation2 + $0x590] sm:$0xff]  ;;  %v202_v51 = vld [vmem:[#allocation2 + $0x598] sm:$0xff]  ;;  %969 = vst [vmem:[#allocation5 + $0x588] sm:$0xff] %v200_v49 }
  0x6d   :  { %970 = vst [vmem:[#allocation5 + $0x590] sm:$0xff] %v201_v50  ;;  %971 = vst.msk [vmem:[#allocation5 + $0x598] sm:$0xff] %vm793_vm0, %v202_v51  ;;  %v203_v52 = vld [vmem:[#allocation2 + $0x5a0] sm:$0xff]  ;;  %v204_v53 = vld [vmem:[#allocation2 + $0x5a8] sm:$0xff] }
  0x6e   :  { %v205_v54 = vld [vmem:[#allocation2 + $0x5b0] sm:$0xff]  ;;  %972 = vst [vmem:[#allocation5 + $0x5a0] sm:$0xff] %v203_v52  ;;  %973 = vst [vmem:[#allocation5 + $0x5a8] sm:$0xff] %v204_v53  ;;  %v206_v55 = vld [vmem:[#allocation2 + $0x5b8] sm:$0xff] }
  0x6f   :  { %974 = vst.msk [vmem:[#allocation5 + $0x5b0] sm:$0xff] %vm793_vm0, %v205_v54  ;;  %v207_v56 = vld [vmem:[#allocation2 + $0x5c0] sm:$0xff]  ;;  %v208_v57 = vld [vmem:[#allocation2 + $0x5c8] sm:$0xff]  ;;  %975 = vst [vmem:[#allocation5 + $0x5b8] sm:$0xff] %v206_v55 }
  0x70   :  { %976 = vst [vmem:[#allocation5 + $0x5c0] sm:$0xff] %v207_v56  ;;  %977 = vst.msk [vmem:[#allocation5 + $0x5c8] sm:$0xff] %vm793_vm0, %v208_v57  ;;  %v209_v58 = vld [vmem:[#allocation2 + $0x5d0] sm:$0xff]  ;;  %v210_v59 = vld [vmem:[#allocation2 + $0x5d8] sm:$0xff] }
  0x71   :  { %v211_v60 = vld [vmem:[#allocation2 + $0x5e0] sm:$0xff]  ;;  %978 = vst [vmem:[#allocation5 + $0x5d0] sm:$0xff] %v209_v58  ;;  %979 = vst [vmem:[#allocation5 + $0x5d8] sm:$0xff] %v210_v59  ;;  %v212_v61 = vld [vmem:[#allocation2 + $0x5e8] sm:$0xff] }
  0x72   :  { %980 = vst.msk [vmem:[#allocation5 + $0x5e0] sm:$0xff] %vm793_vm0, %v211_v60  ;;  %v213_v62 = vld [vmem:[#allocation2 + $0x5f0] sm:$0xff]  ;;  %v214_v63 = vld [vmem:[#allocation2 + $0x5f8] sm:$0xff]  ;;  %981 = vst [vmem:[#allocation5 + $0x5e8] sm:$0xff] %v212_v61 }
  0x73   :  { %982 = vst [vmem:[#allocation5 + $0x5f0] sm:$0xff] %v213_v62  ;;  %983 = vst.msk [vmem:[#allocation5 + $0x5f8] sm:$0xff] %vm793_vm0, %v214_v63  ;;  %v215_v0 = vld [vmem:[#allocation2 + $0x600] sm:$0xff]  ;;  %v216_v1 = vld [vmem:[#allocation2 + $0x608] sm:$0xff] }
  0x74   :  { %v217_v2 = vld [vmem:[#allocation2 + $0x610] sm:$0xff]  ;;  %984 = vst [vmem:[#allocation5 + $0x600] sm:$0xff] %v215_v0  ;;  %985 = vst [vmem:[#allocation5 + $0x608] sm:$0xff] %v216_v1  ;;  %v218_v3 = vld [vmem:[#allocation2 + $0x618] sm:$0xff] }
  0x75   :  { %986 = vst.msk [vmem:[#allocation5 + $0x610] sm:$0xff] %vm793_vm0, %v217_v2  ;;  %v219_v4 = vld [vmem:[#allocation2 + $0x620] sm:$0xff]  ;;  %v220_v5 = vld [vmem:[#allocation2 + $0x628] sm:$0xff]  ;;  %987 = vst [vmem:[#allocation5 + $0x618] sm:$0xff] %v218_v3 }
  0x76   :  { %988 = vst [vmem:[#allocation5 + $0x620] sm:$0xff] %v219_v4  ;;  %989 = vst.msk [vmem:[#allocation5 + $0x628] sm:$0xff] %vm793_vm0, %v220_v5  ;;  %v221_v6 = vld [vmem:[#allocation2 + $0x630] sm:$0xff]  ;;  %v222_v7 = vld [vmem:[#allocation2 + $0x638] sm:$0xff] }
  0x77   :  { %v223_v8 = vld [vmem:[#allocation2 + $0x640] sm:$0xff]  ;;  %990 = vst [vmem:[#allocation5 + $0x630] sm:$0xff] %v221_v6  ;;  %991 = vst [vmem:[#allocation5 + $0x638] sm:$0xff] %v222_v7  ;;  %v224_v9 = vld [vmem:[#allocation2 + $0x648] sm:$0xff] }
  0x78   :  { %992 = vst.msk [vmem:[#allocation5 + $0x640] sm:$0xff] %vm793_vm0, %v223_v8  ;;  %v225_v10 = vld [vmem:[#allocation2 + $0x650] sm:$0xff]  ;;  %v226_v11 = vld [vmem:[#allocation2 + $0x658] sm:$0xff]  ;;  %993 = vst [vmem:[#allocation5 + $0x648] sm:$0xff] %v224_v9 }
  0x79   :  { %994 = vst [vmem:[#allocation5 + $0x650] sm:$0xff] %v225_v10  ;;  %995 = vst.msk [vmem:[#allocation5 + $0x658] sm:$0xff] %vm793_vm0, %v226_v11  ;;  %v227_v12 = vld [vmem:[#allocation2 + $0x660] sm:$0xff]  ;;  %v228_v13 = vld [vmem:[#allocation2 + $0x668] sm:$0xff] }
  0x7a   :  { %v229_v14 = vld [vmem:[#allocation2 + $0x670] sm:$0xff]  ;;  %996 = vst [vmem:[#allocation5 + $0x660] sm:$0xff] %v227_v12  ;;  %997 = vst [vmem:[#allocation5 + $0x668] sm:$0xff] %v228_v13  ;;  %v230_v15 = vld [vmem:[#allocation2 + $0x678] sm:$0xff] }
  0x7b   :  { %998 = vst.msk [vmem:[#allocation5 + $0x670] sm:$0xff] %vm793_vm0, %v229_v14  ;;  %v231_v16 = vld [vmem:[#allocation2 + $0x680] sm:$0xff]  ;;  %v232_v17 = vld [vmem:[#allocation2 + $0x688] sm:$0xff]  ;;  %999 = vst [vmem:[#allocation5 + $0x678] sm:$0xff] %v230_v15 }
  0x7c   :  { %1000 = vst [vmem:[#allocation5 + $0x680] sm:$0xff] %v231_v16  ;;  %1001 = vst.msk [vmem:[#allocation5 + $0x688] sm:$0xff] %vm793_vm0, %v232_v17  ;;  %v233_v18 = vld [vmem:[#allocation2 + $0x690] sm:$0xff]  ;;  %v234_v19 = vld [vmem:[#allocation2 + $0x698] sm:$0xff] }
  0x7d   :  { %v235_v20 = vld [vmem:[#allocation2 + $0x6a0] sm:$0xff]  ;;  %1002 = vst [vmem:[#allocation5 + $0x690] sm:$0xff] %v233_v18  ;;  %1003 = vst [vmem:[#allocation5 + $0x698] sm:$0xff] %v234_v19  ;;  %v236_v21 = vld [vmem:[#allocation2 + $0x6a8] sm:$0xff] }
  0x7e   :  { %1004 = vst.msk [vmem:[#allocation5 + $0x6a0] sm:$0xff] %vm793_vm0, %v235_v20  ;;  %v237_v22 = vld [vmem:[#allocation2 + $0x6b0] sm:$0xff]  ;;  %v238_v23 = vld [vmem:[#allocation2 + $0x6b8] sm:$0xff]  ;;  %1005 = vst [vmem:[#allocation5 + $0x6a8] sm:$0xff] %v236_v21 }
  0x7f   :  { %1006 = vst [vmem:[#allocation5 + $0x6b0] sm:$0xff] %v237_v22  ;;  %1007 = vst.msk [vmem:[#allocation5 + $0x6b8] sm:$0xff] %vm793_vm0, %v238_v23  ;;  %v239_v24 = vld [vmem:[#allocation2 + $0x6c0] sm:$0xff]  ;;  %v240_v25 = vld [vmem:[#allocation2 + $0x6c8] sm:$0xff] }
  0x80   :  { %v241_v26 = vld [vmem:[#allocation2 + $0x6d0] sm:$0xff]  ;;  %1008 = vst [vmem:[#allocation5 + $0x6c0] sm:$0xff] %v239_v24  ;;  %1009 = vst [vmem:[#allocation5 + $0x6c8] sm:$0xff] %v240_v25  ;;  %v242_v27 = vld [vmem:[#allocation2 + $0x6d8] sm:$0xff] }
  0x81   :  { %1010 = vst.msk [vmem:[#allocation5 + $0x6d0] sm:$0xff] %vm793_vm0, %v241_v26  ;;  %v243_v28 = vld [vmem:[#allocation2 + $0x6e0] sm:$0xff]  ;;  %v244_v29 = vld [vmem:[#allocation2 + $0x6e8] sm:$0xff]  ;;  %1011 = vst [vmem:[#allocation5 + $0x6d8] sm:$0xff] %v242_v27 }
  0x82   :  { %1012 = vst [vmem:[#allocation5 + $0x6e0] sm:$0xff] %v243_v28  ;;  %1013 = vst.msk [vmem:[#allocation5 + $0x6e8] sm:$0xff] %vm793_vm0, %v244_v29  ;;  %v245_v30 = vld [vmem:[#allocation2 + $0x6f0] sm:$0xff]  ;;  %v246_v31 = vld [vmem:[#allocation2 + $0x6f8] sm:$0xff] }
  0x83   :  { %v247_v32 = vld [vmem:[#allocation2 + $0x700] sm:$0xff]  ;;  %1014 = vst [vmem:[#allocation5 + $0x6f0] sm:$0xff] %v245_v30  ;;  %1015 = vst [vmem:[#allocation5 + $0x6f8] sm:$0xff] %v246_v31  ;;  %v248_v33 = vld [vmem:[#allocation2 + $0x708] sm:$0xff] }
  0x84   :  { %1016 = vst.msk [vmem:[#allocation5 + $0x700] sm:$0xff] %vm793_vm0, %v247_v32  ;;  %v249_v34 = vld [vmem:[#allocation2 + $0x710] sm:$0xff]  ;;  %v250_v35 = vld [vmem:[#allocation2 + $0x718] sm:$0xff]  ;;  %1017 = vst [vmem:[#allocation5 + $0x708] sm:$0xff] %v248_v33 }
  0x85   :  { %1018 = vst [vmem:[#allocation5 + $0x710] sm:$0xff] %v249_v34  ;;  %1019 = vst.msk [vmem:[#allocation5 + $0x718] sm:$0xff] %vm793_vm0, %v250_v35  ;;  %v251_v36 = vld [vmem:[#allocation2 + $0x720] sm:$0xff]  ;;  %v252_v37 = vld [vmem:[#allocation2 + $0x728] sm:$0xff] }
  0x86   :  { %v253_v38 = vld [vmem:[#allocation2 + $0x730] sm:$0xff]  ;;  %1020 = vst [vmem:[#allocation5 + $0x720] sm:$0xff] %v251_v36  ;;  %1021 = vst [vmem:[#allocation5 + $0x728] sm:$0xff] %v252_v37  ;;  %v254_v39 = vld [vmem:[#allocation2 + $0x738] sm:$0xff] }
  0x87   :  { %1022 = vst.msk [vmem:[#allocation5 + $0x730] sm:$0xff] %vm793_vm0, %v253_v38  ;;  %v255_v40 = vld [vmem:[#allocation2 + $0x740] sm:$0xff]  ;;  %v256_v41 = vld [vmem:[#allocation2 + $0x748] sm:$0xff]  ;;  %1023 = vst [vmem:[#allocation5 + $0x738] sm:$0xff] %v254_v39 }
  0x88   :  { %1024 = vst [vmem:[#allocation5 + $0x740] sm:$0xff] %v255_v40  ;;  %1025 = vst.msk [vmem:[#allocation5 + $0x748] sm:$0xff] %vm793_vm0, %v256_v41  ;;  %v257_v42 = vld [vmem:[#allocation2 + $0x750] sm:$0xff]  ;;  %v258_v43 = vld [vmem:[#allocation2 + $0x758] sm:$0xff] }
  0x89   :  { %v259_v44 = vld [vmem:[#allocation2 + $0x760] sm:$0xff]  ;;  %1026 = vst [vmem:[#allocation5 + $0x750] sm:$0xff] %v257_v42  ;;  %1027 = vst [vmem:[#allocation5 + $0x758] sm:$0xff] %v258_v43  ;;  %v260_v45 = vld [vmem:[#allocation2 + $0x768] sm:$0xff] }
  0x8a   :  { %1028 = vst.msk [vmem:[#allocation5 + $0x760] sm:$0xff] %vm793_vm0, %v259_v44  ;;  %v261_v46 = vld [vmem:[#allocation2 + $0x770] sm:$0xff]  ;;  %v262_v47 = vld [vmem:[#allocation2 + $0x778] sm:$0xff]  ;;  %1029 = vst [vmem:[#allocation5 + $0x768] sm:$0xff] %v260_v45 }
  0x8b   :  { %1030 = vst [vmem:[#allocation5 + $0x770] sm:$0xff] %v261_v46  ;;  %1031 = vst.msk [vmem:[#allocation5 + $0x778] sm:$0xff] %vm793_vm0, %v262_v47  ;;  %v263_v48 = vld [vmem:[#allocation2 + $0x780] sm:$0xff]  ;;  %v264_v49 = vld [vmem:[#allocation2 + $0x788] sm:$0xff] }
  0x8c   :  { %v265_v50 = vld [vmem:[#allocation2 + $0x790] sm:$0xff]  ;;  %1032 = vst [vmem:[#allocation5 + $0x780] sm:$0xff] %v263_v48  ;;  %1033 = vst [vmem:[#allocation5 + $0x788] sm:$0xff] %v264_v49  ;;  %v266_v51 = vld [vmem:[#allocation2 + $0x798] sm:$0xff] }
  0x8d   :  { %1034 = vst.msk [vmem:[#allocation5 + $0x790] sm:$0xff] %vm793_vm0, %v265_v50  ;;  %v267_v52 = vld [vmem:[#allocation2 + $0x7a0] sm:$0xff]  ;;  %v268_v53 = vld [vmem:[#allocation2 + $0x7a8] sm:$0xff]  ;;  %1035 = vst [vmem:[#allocation5 + $0x798] sm:$0xff] %v266_v51 }
  0x8e   :  { %1036 = vst [vmem:[#allocation5 + $0x7a0] sm:$0xff] %v267_v52  ;;  %1037 = vst.msk [vmem:[#allocation5 + $0x7a8] sm:$0xff] %vm793_vm0, %v268_v53  ;;  %v269_v54 = vld [vmem:[#allocation2 + $0x7b0] sm:$0xff]  ;;  %v270_v55 = vld [vmem:[#allocation2 + $0x7b8] sm:$0xff] }
  0x8f   :  { %v271_v56 = vld [vmem:[#allocation2 + $0x7c0] sm:$0xff]  ;;  %1038 = vst [vmem:[#allocation5 + $0x7b0] sm:$0xff] %v269_v54  ;;  %1039 = vst [vmem:[#allocation5 + $0x7b8] sm:$0xff] %v270_v55  ;;  %v272_v57 = vld [vmem:[#allocation2 + $0x7c8] sm:$0xff] }
  0x90   :  { %1040 = vst.msk [vmem:[#allocation5 + $0x7c0] sm:$0xff] %vm793_vm0, %v271_v56  ;;  %v273_v58 = vld [vmem:[#allocation2 + $0x7d0] sm:$0xff]  ;;  %v274_v59 = vld [vmem:[#allocation2 + $0x7d8] sm:$0xff]  ;;  %1041 = vst [vmem:[#allocation5 + $0x7c8] sm:$0xff] %v272_v57 }
  0x91   :  { %1042 = vst [vmem:[#allocation5 + $0x7d0] sm:$0xff] %v273_v58  ;;  %1043 = vst.msk [vmem:[#allocation5 + $0x7d8] sm:$0xff] %vm793_vm0, %v274_v59  ;;  %v275_v60 = vld [vmem:[#allocation2 + $0x7e0] sm:$0xff]  ;;  %v276_v61 = vld [vmem:[#allocation2 + $0x7e8] sm:$0xff] }
  0x92   :  { %v277_v62 = vld [vmem:[#allocation2 + $0x7f0] sm:$0xff]  ;;  %1044 = vst [vmem:[#allocation5 + $0x7e0] sm:$0xff] %v275_v60  ;;  %1045 = vst [vmem:[#allocation5 + $0x7e8] sm:$0xff] %v276_v61  ;;  %v278_v63 = vld [vmem:[#allocation2 + $0x7f8] sm:$0xff] }
  0x93   :  { %1046 = vst.msk [vmem:[#allocation5 + $0x7f0] sm:$0xff] %vm793_vm0, %v277_v62  ;;  %v279_v0 = vld [vmem:[#allocation2 + $0x800] sm:$0xff]  ;;  %v280_v1 = vld [vmem:[#allocation2 + $0x808] sm:$0xff]  ;;  %1047 = vst [vmem:[#allocation5 + $0x7f8] sm:$0xff] %v278_v63 }
  0x94   :  { %1048 = vst [vmem:[#allocation5 + $0x800] sm:$0xff] %v279_v0  ;;  %1049 = vst.msk [vmem:[#allocation5 + $0x808] sm:$0xff] %vm793_vm0, %v280_v1  ;;  %v281_v2 = vld [vmem:[#allocation2 + $0x810] sm:$0xff]  ;;  %v282_v3 = vld [vmem:[#allocation2 + $0x818] sm:$0xff] }
  0x95   :  { %v283_v4 = vld [vmem:[#allocation2 + $0x820] sm:$0xff]  ;;  %1050 = vst [vmem:[#allocation5 + $0x810] sm:$0xff] %v281_v2  ;;  %1051 = vst [vmem:[#allocation5 + $0x818] sm:$0xff] %v282_v3  ;;  %v284_v5 = vld [vmem:[#allocation2 + $0x828] sm:$0xff] }
  0x96   :  { %1052 = vst.msk [vmem:[#allocation5 + $0x820] sm:$0xff] %vm793_vm0, %v283_v4  ;;  %v285_v6 = vld [vmem:[#allocation2 + $0x830] sm:$0xff]  ;;  %v286_v7 = vld [vmem:[#allocation2 + $0x838] sm:$0xff]  ;;  %1053 = vst [vmem:[#allocation5 + $0x828] sm:$0xff] %v284_v5 }
  0x97   :  { %1054 = vst [vmem:[#allocation5 + $0x830] sm:$0xff] %v285_v6  ;;  %1055 = vst.msk [vmem:[#allocation5 + $0x838] sm:$0xff] %vm793_vm0, %v286_v7  ;;  %v287_v8 = vld [vmem:[#allocation2 + $0x840] sm:$0xff]  ;;  %v288_v9 = vld [vmem:[#allocation2 + $0x848] sm:$0xff] }
  0x98   :  { %v289_v10 = vld [vmem:[#allocation2 + $0x850] sm:$0xff]  ;;  %1056 = vst [vmem:[#allocation5 + $0x840] sm:$0xff] %v287_v8  ;;  %1057 = vst [vmem:[#allocation5 + $0x848] sm:$0xff] %v288_v9  ;;  %v290_v11 = vld [vmem:[#allocation2 + $0x858] sm:$0xff] }
  0x99   :  { %1058 = vst.msk [vmem:[#allocation5 + $0x850] sm:$0xff] %vm793_vm0, %v289_v10  ;;  %v291_v12 = vld [vmem:[#allocation2 + $0x860] sm:$0xff]  ;;  %v292_v13 = vld [vmem:[#allocation2 + $0x868] sm:$0xff]  ;;  %1059 = vst [vmem:[#allocation5 + $0x858] sm:$0xff] %v290_v11 }
  0x9a   :  { %1060 = vst [vmem:[#allocation5 + $0x860] sm:$0xff] %v291_v12  ;;  %1061 = vst.msk [vmem:[#allocation5 + $0x868] sm:$0xff] %vm793_vm0, %v292_v13  ;;  %v293_v14 = vld [vmem:[#allocation2 + $0x870] sm:$0xff]  ;;  %v294_v15 = vld [vmem:[#allocation2 + $0x878] sm:$0xff] }
  0x9b   :  { %v295_v16 = vld [vmem:[#allocation2 + $0x880] sm:$0xff]  ;;  %1062 = vst [vmem:[#allocation5 + $0x870] sm:$0xff] %v293_v14  ;;  %1063 = vst [vmem:[#allocation5 + $0x878] sm:$0xff] %v294_v15  ;;  %v296_v17 = vld [vmem:[#allocation2 + $0x888] sm:$0xff] }
  0x9c   :  { %1064 = vst.msk [vmem:[#allocation5 + $0x880] sm:$0xff] %vm793_vm0, %v295_v16  ;;  %v297_v18 = vld [vmem:[#allocation2 + $0x890] sm:$0xff]  ;;  %v298_v19 = vld [vmem:[#allocation2 + $0x898] sm:$0xff]  ;;  %1065 = vst [vmem:[#allocation5 + $0x888] sm:$0xff] %v296_v17 }
  0x9d   :  { %1066 = vst [vmem:[#allocation5 + $0x890] sm:$0xff] %v297_v18  ;;  %1067 = vst.msk [vmem:[#allocation5 + $0x898] sm:$0xff] %vm793_vm0, %v298_v19  ;;  %v299_v20 = vld [vmem:[#allocation2 + $0x8a0] sm:$0xff]  ;;  %v300_v21 = vld [vmem:[#allocation2 + $0x8a8] sm:$0xff] }
  0x9e   :  { %v301_v22 = vld [vmem:[#allocation2 + $0x8b0] sm:$0xff]  ;;  %1068 = vst [vmem:[#allocation5 + $0x8a0] sm:$0xff] %v299_v20  ;;  %1069 = vst [vmem:[#allocation5 + $0x8a8] sm:$0xff] %v300_v21  ;;  %v302_v23 = vld [vmem:[#allocation2 + $0x8b8] sm:$0xff] }
  0x9f   :  { %1070 = vst.msk [vmem:[#allocation5 + $0x8b0] sm:$0xff] %vm793_vm0, %v301_v22  ;;  %v303_v24 = vld [vmem:[#allocation2 + $0x8c0] sm:$0xff]  ;;  %v304_v25 = vld [vmem:[#allocation2 + $0x8c8] sm:$0xff]  ;;  %1071 = vst [vmem:[#allocation5 + $0x8b8] sm:$0xff] %v302_v23 }
  0xa0   :  { %1072 = vst [vmem:[#allocation5 + $0x8c0] sm:$0xff] %v303_v24  ;;  %1073 = vst.msk [vmem:[#allocation5 + $0x8c8] sm:$0xff] %vm793_vm0, %v304_v25  ;;  %v305_v26 = vld [vmem:[#allocation2 + $0x8d0] sm:$0xff]  ;;  %v306_v27 = vld [vmem:[#allocation2 + $0x8d8] sm:$0xff] }
  0xa1   :  { %v307_v28 = vld [vmem:[#allocation2 + $0x8e0] sm:$0xff]  ;;  %1074 = vst [vmem:[#allocation5 + $0x8d0] sm:$0xff] %v305_v26  ;;  %1075 = vst [vmem:[#allocation5 + $0x8d8] sm:$0xff] %v306_v27  ;;  %v308_v29 = vld [vmem:[#allocation2 + $0x8e8] sm:$0xff] }
  0xa2   :  { %1076 = vst.msk [vmem:[#allocation5 + $0x8e0] sm:$0xff] %vm793_vm0, %v307_v28  ;;  %v309_v30 = vld [vmem:[#allocation2 + $0x8f0] sm:$0xff]  ;;  %v310_v31 = vld [vmem:[#allocation2 + $0x8f8] sm:$0xff]  ;;  %1077 = vst [vmem:[#allocation5 + $0x8e8] sm:$0xff] %v308_v29 }
  0xa3   :  { %1078 = vst [vmem:[#allocation5 + $0x8f0] sm:$0xff] %v309_v30  ;;  %1079 = vst.msk [vmem:[#allocation5 + $0x8f8] sm:$0xff] %vm793_vm0, %v310_v31  ;;  %v311_v32 = vld [vmem:[#allocation2 + $0x900] sm:$0xff]  ;;  %v312_v33 = vld [vmem:[#allocation2 + $0x908] sm:$0xff] }
  0xa4   :  { %v313_v34 = vld [vmem:[#allocation2 + $0x910] sm:$0xff]  ;;  %1080 = vst [vmem:[#allocation5 + $0x900] sm:$0xff] %v311_v32  ;;  %1081 = vst [vmem:[#allocation5 + $0x908] sm:$0xff] %v312_v33  ;;  %v314_v35 = vld [vmem:[#allocation2 + $0x918] sm:$0xff] }
  0xa5   :  { %1082 = vst.msk [vmem:[#allocation5 + $0x910] sm:$0xff] %vm793_vm0, %v313_v34  ;;  %v315_v36 = vld [vmem:[#allocation2 + $0x920] sm:$0xff]  ;;  %v316_v37 = vld [vmem:[#allocation2 + $0x928] sm:$0xff]  ;;  %1083 = vst [vmem:[#allocation5 + $0x918] sm:$0xff] %v314_v35 }
  0xa6   :  { %1084 = vst [vmem:[#allocation5 + $0x920] sm:$0xff] %v315_v36  ;;  %1085 = vst.msk [vmem:[#allocation5 + $0x928] sm:$0xff] %vm793_vm0, %v316_v37  ;;  %v317_v38 = vld [vmem:[#allocation2 + $0x930] sm:$0xff]  ;;  %v318_v39 = vld [vmem:[#allocation2 + $0x938] sm:$0xff] }
  0xa7   :  { %v319_v40 = vld [vmem:[#allocation2 + $0x940] sm:$0xff]  ;;  %1086 = vst [vmem:[#allocation5 + $0x930] sm:$0xff] %v317_v38  ;;  %1087 = vst [vmem:[#allocation5 + $0x938] sm:$0xff] %v318_v39  ;;  %v320_v41 = vld [vmem:[#allocation2 + $0x948] sm:$0xff] }
  0xa8   :  { %1088 = vst.msk [vmem:[#allocation5 + $0x940] sm:$0xff] %vm793_vm0, %v319_v40  ;;  %v321_v42 = vld [vmem:[#allocation2 + $0x950] sm:$0xff]  ;;  %v322_v43 = vld [vmem:[#allocation2 + $0x958] sm:$0xff]  ;;  %1089 = vst [vmem:[#allocation5 + $0x948] sm:$0xff] %v320_v41 }
  0xa9   :  { %1090 = vst [vmem:[#allocation5 + $0x950] sm:$0xff] %v321_v42  ;;  %1091 = vst.msk [vmem:[#allocation5 + $0x958] sm:$0xff] %vm793_vm0, %v322_v43  ;;  %v323_v44 = vld [vmem:[#allocation2 + $0x960] sm:$0xff]  ;;  %v324_v45 = vld [vmem:[#allocation2 + $0x968] sm:$0xff] }
  0xaa   :  { %v325_v46 = vld [vmem:[#allocation2 + $0x970] sm:$0xff]  ;;  %1092 = vst [vmem:[#allocation5 + $0x960] sm:$0xff] %v323_v44  ;;  %1093 = vst [vmem:[#allocation5 + $0x968] sm:$0xff] %v324_v45  ;;  %v326_v47 = vld [vmem:[#allocation2 + $0x978] sm:$0xff] }
  0xab   :  { %1094 = vst.msk [vmem:[#allocation5 + $0x970] sm:$0xff] %vm793_vm0, %v325_v46  ;;  %v327_v48 = vld [vmem:[#allocation2 + $0x980] sm:$0xff]  ;;  %v328_v49 = vld [vmem:[#allocation2 + $0x988] sm:$0xff]  ;;  %1095 = vst [vmem:[#allocation5 + $0x978] sm:$0xff] %v326_v47 }
  0xac   :  { %1096 = vst [vmem:[#allocation5 + $0x980] sm:$0xff] %v327_v48  ;;  %1097 = vst.msk [vmem:[#allocation5 + $0x988] sm:$0xff] %vm793_vm0, %v328_v49  ;;  %v329_v50 = vld [vmem:[#allocation2 + $0x990] sm:$0xff]  ;;  %v330_v51 = vld [vmem:[#allocation2 + $0x998] sm:$0xff] }
  0xad   :  { %v331_v52 = vld [vmem:[#allocation2 + $0x9a0] sm:$0xff]  ;;  %1098 = vst [vmem:[#allocation5 + $0x990] sm:$0xff] %v329_v50  ;;  %1099 = vst [vmem:[#allocation5 + $0x998] sm:$0xff] %v330_v51  ;;  %v332_v53 = vld [vmem:[#allocation2 + $0x9a8] sm:$0xff] }
  0xae   :  { %1100 = vst.msk [vmem:[#allocation5 + $0x9a0] sm:$0xff] %vm793_vm0, %v331_v52  ;;  %v333_v54 = vld [vmem:[#allocation2 + $0x9b0] sm:$0xff]  ;;  %v334_v55 = vld [vmem:[#allocation2 + $0x9b8] sm:$0xff]  ;;  %1101 = vst [vmem:[#allocation5 + $0x9a8] sm:$0xff] %v332_v53 }
  0xaf   :  { %1102 = vst [vmem:[#allocation5 + $0x9b0] sm:$0xff] %v333_v54  ;;  %1103 = vst.msk [vmem:[#allocation5 + $0x9b8] sm:$0xff] %vm793_vm0, %v334_v55  ;;  %v335_v56 = vld [vmem:[#allocation2 + $0x9c0] sm:$0xff]  ;;  %v336_v57 = vld [vmem:[#allocation2 + $0x9c8] sm:$0xff] }
  0xb0   :  { %v337_v58 = vld [vmem:[#allocation2 + $0x9d0] sm:$0xff]  ;;  %1104 = vst [vmem:[#allocation5 + $0x9c0] sm:$0xff] %v335_v56  ;;  %1105 = vst [vmem:[#allocation5 + $0x9c8] sm:$0xff] %v336_v57  ;;  %v338_v59 = vld [vmem:[#allocation2 + $0x9d8] sm:$0xff] }
  0xb1   :  { %1106 = vst.msk [vmem:[#allocation5 + $0x9d0] sm:$0xff] %vm793_vm0, %v337_v58  ;;  %v339_v60 = vld [vmem:[#allocation2 + $0x9e0] sm:$0xff]  ;;  %v340_v61 = vld [vmem:[#allocation2 + $0x9e8] sm:$0xff]  ;;  %1107 = vst [vmem:[#allocation5 + $0x9d8] sm:$0xff] %v338_v59 }
  0xb2   :  { %1108 = vst [vmem:[#allocation5 + $0x9e0] sm:$0xff] %v339_v60  ;;  %1109 = vst.msk [vmem:[#allocation5 + $0x9e8] sm:$0xff] %vm793_vm0, %v340_v61  ;;  %v341_v62 = vld [vmem:[#allocation2 + $0x9f0] sm:$0xff]  ;;  %v342_v63 = vld [vmem:[#allocation2 + $0x9f8] sm:$0xff] }
  0xb3   :  { %v343_v0 = vld [vmem:[#allocation2 + $0xa00] sm:$0xff]  ;;  %1110 = vst [vmem:[#allocation5 + $0x9f0] sm:$0xff] %v341_v62  ;;  %1111 = vst [vmem:[#allocation5 + $0x9f8] sm:$0xff] %v342_v63  ;;  %v344_v1 = vld [vmem:[#allocation2 + $0xa08] sm:$0xff] }
  0xb4   :  { %1112 = vst.msk [vmem:[#allocation5 + $0xa00] sm:$0xff] %vm793_vm0, %v343_v0  ;;  %v345_v2 = vld [vmem:[#allocation2 + $0xa10] sm:$0xff]  ;;  %v346_v3 = vld [vmem:[#allocation2 + $0xa18] sm:$0xff]  ;;  %1113 = vst [vmem:[#allocation5 + $0xa08] sm:$0xff] %v344_v1 }
  0xb5   :  { %1114 = vst [vmem:[#allocation5 + $0xa10] sm:$0xff] %v345_v2  ;;  %1115 = vst.msk [vmem:[#allocation5 + $0xa18] sm:$0xff] %vm793_vm0, %v346_v3  ;;  %v347_v4 = vld [vmem:[#allocation2 + $0xa20] sm:$0xff]  ;;  %v348_v5 = vld [vmem:[#allocation2 + $0xa28] sm:$0xff] }
  0xb6   :  { %v349_v6 = vld [vmem:[#allocation2 + $0xa30] sm:$0xff]  ;;  %1116 = vst [vmem:[#allocation5 + $0xa20] sm:$0xff] %v347_v4  ;;  %1117 = vst [vmem:[#allocation5 + $0xa28] sm:$0xff] %v348_v5  ;;  %v350_v7 = vld [vmem:[#allocation2 + $0xa38] sm:$0xff] }
  0xb7   :  { %1118 = vst.msk [vmem:[#allocation5 + $0xa30] sm:$0xff] %vm793_vm0, %v349_v6  ;;  %v351_v8 = vld [vmem:[#allocation2 + $0xa40] sm:$0xff]  ;;  %v352_v9 = vld [vmem:[#allocation2 + $0xa48] sm:$0xff]  ;;  %1119 = vst [vmem:[#allocation5 + $0xa38] sm:$0xff] %v350_v7 }
  0xb8   :  { %1120 = vst [vmem:[#allocation5 + $0xa40] sm:$0xff] %v351_v8  ;;  %1121 = vst.msk [vmem:[#allocation5 + $0xa48] sm:$0xff] %vm793_vm0, %v352_v9  ;;  %v353_v10 = vld [vmem:[#allocation2 + $0xa50] sm:$0xff]  ;;  %v354_v11 = vld [vmem:[#allocation2 + $0xa58] sm:$0xff] }
  0xb9   :  { %v355_v12 = vld [vmem:[#allocation2 + $0xa60] sm:$0xff]  ;;  %1122 = vst [vmem:[#allocation5 + $0xa50] sm:$0xff] %v353_v10  ;;  %1123 = vst [vmem:[#allocation5 + $0xa58] sm:$0xff] %v354_v11  ;;  %v356_v13 = vld [vmem:[#allocation2 + $0xa68] sm:$0xff] }
  0xba   :  { %1124 = vst.msk [vmem:[#allocation5 + $0xa60] sm:$0xff] %vm793_vm0, %v355_v12  ;;  %v357_v14 = vld [vmem:[#allocation2 + $0xa70] sm:$0xff]  ;;  %v358_v15 = vld [vmem:[#allocation2 + $0xa78] sm:$0xff]  ;;  %1125 = vst [vmem:[#allocation5 + $0xa68] sm:$0xff] %v356_v13 }
  0xbb   :  { %1126 = vst [vmem:[#allocation5 + $0xa70] sm:$0xff] %v357_v14  ;;  %1127 = vst.msk [vmem:[#allocation5 + $0xa78] sm:$0xff] %vm793_vm0, %v358_v15  ;;  %v359_v16 = vld [vmem:[#allocation2 + $0xa80] sm:$0xff]  ;;  %v360_v17 = vld [vmem:[#allocation2 + $0xa88] sm:$0xff] }
  0xbc   :  { %v361_v18 = vld [vmem:[#allocation2 + $0xa90] sm:$0xff]  ;;  %1128 = vst [vmem:[#allocation5 + $0xa80] sm:$0xff] %v359_v16  ;;  %1129 = vst [vmem:[#allocation5 + $0xa88] sm:$0xff] %v360_v17  ;;  %v362_v19 = vld [vmem:[#allocation2 + $0xa98] sm:$0xff] }
  0xbd   :  { %1130 = vst.msk [vmem:[#allocation5 + $0xa90] sm:$0xff] %vm793_vm0, %v361_v18  ;;  %v363_v20 = vld [vmem:[#allocation2 + $0xaa0] sm:$0xff]  ;;  %v364_v21 = vld [vmem:[#allocation2 + $0xaa8] sm:$0xff]  ;;  %1131 = vst [vmem:[#allocation5 + $0xa98] sm:$0xff] %v362_v19 }
  0xbe   :  { %1132 = vst [vmem:[#allocation5 + $0xaa0] sm:$0xff] %v363_v20  ;;  %1133 = vst.msk [vmem:[#allocation5 + $0xaa8] sm:$0xff] %vm793_vm0, %v364_v21  ;;  %v365_v22 = vld [vmem:[#allocation2 + $0xab0] sm:$0xff]  ;;  %v366_v23 = vld [vmem:[#allocation2 + $0xab8] sm:$0xff] }
  0xbf   :  { %v367_v24 = vld [vmem:[#allocation2 + $0xac0] sm:$0xff]  ;;  %1134 = vst [vmem:[#allocation5 + $0xab0] sm:$0xff] %v365_v22  ;;  %1135 = vst [vmem:[#allocation5 + $0xab8] sm:$0xff] %v366_v23  ;;  %v368_v25 = vld [vmem:[#allocation2 + $0xac8] sm:$0xff] }
  0xc0   :  { %1136 = vst.msk [vmem:[#allocation5 + $0xac0] sm:$0xff] %vm793_vm0, %v367_v24  ;;  %v369_v26 = vld [vmem:[#allocation2 + $0xad0] sm:$0xff]  ;;  %v370_v27 = vld [vmem:[#allocation2 + $0xad8] sm:$0xff]  ;;  %1137 = vst [vmem:[#allocation5 + $0xac8] sm:$0xff] %v368_v25 }
  0xc1   :  { %1138 = vst [vmem:[#allocation5 + $0xad0] sm:$0xff] %v369_v26  ;;  %1139 = vst.msk [vmem:[#allocation5 + $0xad8] sm:$0xff] %vm793_vm0, %v370_v27  ;;  %v371_v28 = vld [vmem:[#allocation2 + $0xae0] sm:$0xff]  ;;  %v372_v29 = vld [vmem:[#allocation2 + $0xae8] sm:$0xff] }
  0xc2   :  { %v373_v30 = vld [vmem:[#allocation2 + $0xaf0] sm:$0xff]  ;;  %1140 = vst [vmem:[#allocation5 + $0xae0] sm:$0xff] %v371_v28  ;;  %1141 = vst [vmem:[#allocation5 + $0xae8] sm:$0xff] %v372_v29  ;;  %v374_v31 = vld [vmem:[#allocation2 + $0xaf8] sm:$0xff] }
  0xc3   :  { %1142 = vst.msk [vmem:[#allocation5 + $0xaf0] sm:$0xff] %vm793_vm0, %v373_v30  ;;  %v375_v32 = vld [vmem:[#allocation2 + $0xb00] sm:$0xff]  ;;  %v376_v33 = vld [vmem:[#allocation2 + $0xb08] sm:$0xff]  ;;  %1143 = vst [vmem:[#allocation5 + $0xaf8] sm:$0xff] %v374_v31 }
  0xc4   :  { %1144 = vst [vmem:[#allocation5 + $0xb00] sm:$0xff] %v375_v32  ;;  %1145 = vst.msk [vmem:[#allocation5 + $0xb08] sm:$0xff] %vm793_vm0, %v376_v33  ;;  %v377_v34 = vld [vmem:[#allocation2 + $0xb10] sm:$0xff]  ;;  %v378_v35 = vld [vmem:[#allocation2 + $0xb18] sm:$0xff] }
  0xc5   :  { %v379_v36 = vld [vmem:[#allocation2 + $0xb20] sm:$0xff]  ;;  %1146 = vst [vmem:[#allocation5 + $0xb10] sm:$0xff] %v377_v34  ;;  %1147 = vst [vmem:[#allocation5 + $0xb18] sm:$0xff] %v378_v35  ;;  %v380_v37 = vld [vmem:[#allocation2 + $0xb28] sm:$0xff] }
  0xc6   :  { %1148 = vst.msk [vmem:[#allocation5 + $0xb20] sm:$0xff] %vm793_vm0, %v379_v36  ;;  %v381_v38 = vld [vmem:[#allocation2 + $0xb30] sm:$0xff]  ;;  %v382_v39 = vld [vmem:[#allocation2 + $0xb38] sm:$0xff]  ;;  %1149 = vst [vmem:[#allocation5 + $0xb28] sm:$0xff] %v380_v37 }
  0xc7   :  { %1150 = vst [vmem:[#allocation5 + $0xb30] sm:$0xff] %v381_v38  ;;  %1151 = vst.msk [vmem:[#allocation5 + $0xb38] sm:$0xff] %vm793_vm0, %v382_v39  ;;  %v383_v40 = vld [vmem:[#allocation2 + $0xb40] sm:$0xff]  ;;  %v384_v41 = vld [vmem:[#allocation2 + $0xb48] sm:$0xff] }
  0xc8   :  { %v385_v42 = vld [vmem:[#allocation2 + $0xb50] sm:$0xff]  ;;  %1152 = vst [vmem:[#allocation5 + $0xb40] sm:$0xff] %v383_v40  ;;  %1153 = vst [vmem:[#allocation5 + $0xb48] sm:$0xff] %v384_v41  ;;  %v386_v43 = vld [vmem:[#allocation2 + $0xb58] sm:$0xff] }
  0xc9   :  { %1154 = vst.msk [vmem:[#allocation5 + $0xb50] sm:$0xff] %vm793_vm0, %v385_v42  ;;  %v387_v44 = vld [vmem:[#allocation2 + $0xb60] sm:$0xff]  ;;  %v388_v45 = vld [vmem:[#allocation2 + $0xb68] sm:$0xff]  ;;  %1155 = vst [vmem:[#allocation5 + $0xb58] sm:$0xff] %v386_v43 }
  0xca   :  { %1156 = vst [vmem:[#allocation5 + $0xb60] sm:$0xff] %v387_v44  ;;  %1157 = vst.msk [vmem:[#allocation5 + $0xb68] sm:$0xff] %vm793_vm0, %v388_v45  ;;  %v389_v46 = vld [vmem:[#allocation2 + $0xb70] sm:$0xff]  ;;  %v390_v47 = vld [vmem:[#allocation2 + $0xb78] sm:$0xff] }
  0xcb   :  { %v391_v48 = vld [vmem:[#allocation2 + $0xb80] sm:$0xff]  ;;  %1158 = vst [vmem:[#allocation5 + $0xb70] sm:$0xff] %v389_v46  ;;  %1159 = vst [vmem:[#allocation5 + $0xb78] sm:$0xff] %v390_v47  ;;  %v392_v49 = vld [vmem:[#allocation2 + $0xb88] sm:$0xff] }
  0xcc   :  { %1160 = vst.msk [vmem:[#allocation5 + $0xb80] sm:$0xff] %vm793_vm0, %v391_v48  ;;  %v393_v50 = vld [vmem:[#allocation2 + $0xb90] sm:$0xff]  ;;  %v394_v51 = vld [vmem:[#allocation2 + $0xb98] sm:$0xff]  ;;  %1161 = vst [vmem:[#allocation5 + $0xb88] sm:$0xff] %v392_v49 }
  0xcd   :  { %1162 = vst [vmem:[#allocation5 + $0xb90] sm:$0xff] %v393_v50  ;;  %1163 = vst.msk [vmem:[#allocation5 + $0xb98] sm:$0xff] %vm793_vm0, %v394_v51  ;;  %v395_v52 = vld [vmem:[#allocation2 + $0xba0] sm:$0xff]  ;;  %v396_v53 = vld [vmem:[#allocation2 + $0xba8] sm:$0xff] }
  0xce   :  { %v397_v54 = vld [vmem:[#allocation2 + $0xbb0] sm:$0xff]  ;;  %1164 = vst [vmem:[#allocation5 + $0xba0] sm:$0xff] %v395_v52  ;;  %1165 = vst [vmem:[#allocation5 + $0xba8] sm:$0xff] %v396_v53  ;;  %v398_v55 = vld [vmem:[#allocation2 + $0xbb8] sm:$0xff] }
  0xcf   :  { %1166 = vst.msk [vmem:[#allocation5 + $0xbb0] sm:$0xff] %vm793_vm0, %v397_v54  ;;  %v399_v56 = vld [vmem:[#allocation2 + $0xbc0] sm:$0xff]  ;;  %v400_v57 = vld [vmem:[#allocation2 + $0xbc8] sm:$0xff]  ;;  %1167 = vst [vmem:[#allocation5 + $0xbb8] sm:$0xff] %v398_v55 }
  0xd0   :  { %1168 = vst [vmem:[#allocation5 + $0xbc0] sm:$0xff] %v399_v56  ;;  %1169 = vst.msk [vmem:[#allocation5 + $0xbc8] sm:$0xff] %vm793_vm0, %v400_v57  ;;  %v401_v58 = vld [vmem:[#allocation2 + $0xbd0] sm:$0xff]  ;;  %v402_v59 = vld [vmem:[#allocation2 + $0xbd8] sm:$0xff] }
  0xd1   :  { %v403_v60 = vld [vmem:[#allocation2 + $0xbe0] sm:$0xff]  ;;  %1170 = vst [vmem:[#allocation5 + $0xbd0] sm:$0xff] %v401_v58  ;;  %1171 = vst [vmem:[#allocation5 + $0xbd8] sm:$0xff] %v402_v59  ;;  %v404_v61 = vld [vmem:[#allocation2 + $0xbe8] sm:$0xff] }
  0xd2   :  { %1172 = vst.msk [vmem:[#allocation5 + $0xbe0] sm:$0xff] %vm793_vm0, %v403_v60  ;;  %v405_v62 = vld [vmem:[#allocation2 + $0xbf0] sm:$0xff]  ;;  %v406_v63 = vld [vmem:[#allocation2 + $0xbf8] sm:$0xff]  ;;  %1173 = vst [vmem:[#allocation5 + $0xbe8] sm:$0xff] %v404_v61 }
  0xd3   :  { %1174 = vst [vmem:[#allocation5 + $0xbf0] sm:$0xff] %v405_v62  ;;  %1175 = vst.msk [vmem:[#allocation5 + $0xbf8] sm:$0xff] %vm793_vm0, %v406_v63  ;;  %v407_v0 = vld [vmem:[#allocation2 + $0xc00] sm:$0xff]  ;;  %v408_v1 = vld [vmem:[#allocation2 + $0xc08] sm:$0xff] }
  0xd4   :  { %v409_v2 = vld [vmem:[#allocation2 + $0xc10] sm:$0xff]  ;;  %1176 = vst [vmem:[#allocation5 + $0xc00] sm:$0xff] %v407_v0  ;;  %1177 = vst [vmem:[#allocation5 + $0xc08] sm:$0xff] %v408_v1  ;;  %v410_v3 = vld [vmem:[#allocation2 + $0xc18] sm:$0xff] }
  0xd5   :  { %1178 = vst.msk [vmem:[#allocation5 + $0xc10] sm:$0xff] %vm793_vm0, %v409_v2  ;;  %v411_v4 = vld [vmem:[#allocation2 + $0xc20] sm:$0xff]  ;;  %v412_v5 = vld [vmem:[#allocation2 + $0xc28] sm:$0xff]  ;;  %1179 = vst [vmem:[#allocation5 + $0xc18] sm:$0xff] %v410_v3 }
  0xd6   :  { %1180 = vst [vmem:[#allocation5 + $0xc20] sm:$0xff] %v411_v4  ;;  %1181 = vst.msk [vmem:[#allocation5 + $0xc28] sm:$0xff] %vm793_vm0, %v412_v5  ;;  %v413_v6 = vld [vmem:[#allocation2 + $0xc30] sm:$0xff]  ;;  %v414_v7 = vld [vmem:[#allocation2 + $0xc38] sm:$0xff] }
  0xd7   :  { %v415_v8 = vld [vmem:[#allocation2 + $0xc40] sm:$0xff]  ;;  %1182 = vst [vmem:[#allocation5 + $0xc30] sm:$0xff] %v413_v6  ;;  %1183 = vst [vmem:[#allocation5 + $0xc38] sm:$0xff] %v414_v7  ;;  %v416_v9 = vld [vmem:[#allocation2 + $0xc48] sm:$0xff] }
  0xd8   :  { %1184 = vst.msk [vmem:[#allocation5 + $0xc40] sm:$0xff] %vm793_vm0, %v415_v8  ;;  %v417_v10 = vld [vmem:[#allocation2 + $0xc50] sm:$0xff]  ;;  %v418_v11 = vld [vmem:[#allocation2 + $0xc58] sm:$0xff]  ;;  %1185 = vst [vmem:[#allocation5 + $0xc48] sm:$0xff] %v416_v9 }
  0xd9   :  { %1186 = vst [vmem:[#allocation5 + $0xc50] sm:$0xff] %v417_v10  ;;  %1187 = vst.msk [vmem:[#allocation5 + $0xc58] sm:$0xff] %vm793_vm0, %v418_v11  ;;  %v419_v12 = vld [vmem:[#allocation2 + $0xc60] sm:$0xff]  ;;  %v420_v13 = vld [vmem:[#allocation2 + $0xc68] sm:$0xff] }
  0xda   :  { %v421_v14 = vld [vmem:[#allocation2 + $0xc70] sm:$0xff]  ;;  %1188 = vst [vmem:[#allocation5 + $0xc60] sm:$0xff] %v419_v12  ;;  %1189 = vst [vmem:[#allocation5 + $0xc68] sm:$0xff] %v420_v13  ;;  %v422_v15 = vld [vmem:[#allocation2 + $0xc78] sm:$0xff] }
  0xdb   :  { %1190 = vst.msk [vmem:[#allocation5 + $0xc70] sm:$0xff] %vm793_vm0, %v421_v14  ;;  %v423_v16 = vld [vmem:[#allocation2 + $0xc80] sm:$0xff]  ;;  %v424_v17 = vld [vmem:[#allocation2 + $0xc88] sm:$0xff]  ;;  %1191 = vst [vmem:[#allocation5 + $0xc78] sm:$0xff] %v422_v15 }
  0xdc   :  { %1192 = vst [vmem:[#allocation5 + $0xc80] sm:$0xff] %v423_v16  ;;  %1193 = vst.msk [vmem:[#allocation5 + $0xc88] sm:$0xff] %vm793_vm0, %v424_v17  ;;  %v425_v18 = vld [vmem:[#allocation2 + $0xc90] sm:$0xff]  ;;  %v426_v19 = vld [vmem:[#allocation2 + $0xc98] sm:$0xff] }
  0xdd   :  { %v427_v20 = vld [vmem:[#allocation2 + $0xca0] sm:$0xff]  ;;  %1194 = vst [vmem:[#allocation5 + $0xc90] sm:$0xff] %v425_v18  ;;  %1195 = vst [vmem:[#allocation5 + $0xc98] sm:$0xff] %v426_v19  ;;  %v428_v21 = vld [vmem:[#allocation2 + $0xca8] sm:$0xff] }
  0xde   :  { %1196 = vst.msk [vmem:[#allocation5 + $0xca0] sm:$0xff] %vm793_vm0, %v427_v20  ;;  %v429_v22 = vld [vmem:[#allocation2 + $0xcb0] sm:$0xff]  ;;  %v430_v23 = vld [vmem:[#allocation2 + $0xcb8] sm:$0xff]  ;;  %1197 = vst [vmem:[#allocation5 + $0xca8] sm:$0xff] %v428_v21 }
  0xdf   :  { %1198 = vst [vmem:[#allocation5 + $0xcb0] sm:$0xff] %v429_v22  ;;  %1199 = vst.msk [vmem:[#allocation5 + $0xcb8] sm:$0xff] %vm793_vm0, %v430_v23  ;;  %v431_v24 = vld [vmem:[#allocation2 + $0xcc0] sm:$0xff]  ;;  %v432_v25 = vld [vmem:[#allocation2 + $0xcc8] sm:$0xff] }
  0xe0   :  { %v433_v26 = vld [vmem:[#allocation2 + $0xcd0] sm:$0xff]  ;;  %1200 = vst [vmem:[#allocation5 + $0xcc0] sm:$0xff] %v431_v24  ;;  %1201 = vst [vmem:[#allocation5 + $0xcc8] sm:$0xff] %v432_v25  ;;  %v434_v27 = vld [vmem:[#allocation2 + $0xcd8] sm:$0xff] }
  0xe1   :  { %1202 = vst.msk [vmem:[#allocation5 + $0xcd0] sm:$0xff] %vm793_vm0, %v433_v26  ;;  %v435_v28 = vld [vmem:[#allocation2 + $0xce0] sm:$0xff]  ;;  %v436_v29 = vld [vmem:[#allocation2 + $0xce8] sm:$0xff]  ;;  %1203 = vst [vmem:[#allocation5 + $0xcd8] sm:$0xff] %v434_v27 }
  0xe2   :  { %1204 = vst [vmem:[#allocation5 + $0xce0] sm:$0xff] %v435_v28  ;;  %1205 = vst.msk [vmem:[#allocation5 + $0xce8] sm:$0xff] %vm793_vm0, %v436_v29  ;;  %v437_v30 = vld [vmem:[#allocation2 + $0xcf0] sm:$0xff]  ;;  %v438_v31 = vld [vmem:[#allocation2 + $0xcf8] sm:$0xff] }
  0xe3   :  { %v439_v32 = vld [vmem:[#allocation2 + $0xd00] sm:$0xff]  ;;  %1206 = vst [vmem:[#allocation5 + $0xcf0] sm:$0xff] %v437_v30  ;;  %1207 = vst [vmem:[#allocation5 + $0xcf8] sm:$0xff] %v438_v31  ;;  %v440_v33 = vld [vmem:[#allocation2 + $0xd08] sm:$0xff] }
  0xe4   :  { %1208 = vst.msk [vmem:[#allocation5 + $0xd00] sm:$0xff] %vm793_vm0, %v439_v32  ;;  %v441_v34 = vld [vmem:[#allocation2 + $0xd10] sm:$0xff]  ;;  %v442_v35 = vld [vmem:[#allocation2 + $0xd18] sm:$0xff]  ;;  %1209 = vst [vmem:[#allocation5 + $0xd08] sm:$0xff] %v440_v33 }
  0xe5   :  { %1210 = vst [vmem:[#allocation5 + $0xd10] sm:$0xff] %v441_v34  ;;  %1211 = vst.msk [vmem:[#allocation5 + $0xd18] sm:$0xff] %vm793_vm0, %v442_v35  ;;  %v443_v36 = vld [vmem:[#allocation2 + $0xd20] sm:$0xff]  ;;  %v444_v37 = vld [vmem:[#allocation2 + $0xd28] sm:$0xff] }
  0xe6   :  { %v445_v38 = vld [vmem:[#allocation2 + $0xd30] sm:$0xff]  ;;  %1212 = vst [vmem:[#allocation5 + $0xd20] sm:$0xff] %v443_v36  ;;  %1213 = vst [vmem:[#allocation5 + $0xd28] sm:$0xff] %v444_v37  ;;  %v446_v39 = vld [vmem:[#allocation2 + $0xd38] sm:$0xff] }
  0xe7   :  { %1214 = vst.msk [vmem:[#allocation5 + $0xd30] sm:$0xff] %vm793_vm0, %v445_v38  ;;  %v447_v40 = vld [vmem:[#allocation2 + $0xd40] sm:$0xff]  ;;  %v448_v41 = vld [vmem:[#allocation2 + $0xd48] sm:$0xff]  ;;  %1215 = vst [vmem:[#allocation5 + $0xd38] sm:$0xff] %v446_v39 }
  0xe8   :  { %1216 = vst [vmem:[#allocation5 + $0xd40] sm:$0xff] %v447_v40  ;;  %1217 = vst.msk [vmem:[#allocation5 + $0xd48] sm:$0xff] %vm793_vm0, %v448_v41  ;;  %v449_v42 = vld [vmem:[#allocation2 + $0xd50] sm:$0xff]  ;;  %v450_v43 = vld [vmem:[#allocation2 + $0xd58] sm:$0xff] }
  0xe9   :  { %v451_v44 = vld [vmem:[#allocation2 + $0xd60] sm:$0xff]  ;;  %1218 = vst [vmem:[#allocation5 + $0xd50] sm:$0xff] %v449_v42  ;;  %1219 = vst [vmem:[#allocation5 + $0xd58] sm:$0xff] %v450_v43  ;;  %v452_v45 = vld [vmem:[#allocation2 + $0xd68] sm:$0xff] }
  0xea   :  { %1220 = vst.msk [vmem:[#allocation5 + $0xd60] sm:$0xff] %vm793_vm0, %v451_v44  ;;  %v453_v46 = vld [vmem:[#allocation2 + $0xd70] sm:$0xff]  ;;  %v454_v47 = vld [vmem:[#allocation2 + $0xd78] sm:$0xff]  ;;  %1221 = vst [vmem:[#allocation5 + $0xd68] sm:$0xff] %v452_v45 }
  0xeb   :  { %1222 = vst [vmem:[#allocation5 + $0xd70] sm:$0xff] %v453_v46  ;;  %1223 = vst.msk [vmem:[#allocation5 + $0xd78] sm:$0xff] %vm793_vm0, %v454_v47  ;;  %v455_v48 = vld [vmem:[#allocation2 + $0xd80] sm:$0xff]  ;;  %v456_v49 = vld [vmem:[#allocation2 + $0xd88] sm:$0xff] }
  0xec   :  { %v457_v50 = vld [vmem:[#allocation2 + $0xd90] sm:$0xff]  ;;  %1224 = vst [vmem:[#allocation5 + $0xd80] sm:$0xff] %v455_v48  ;;  %1225 = vst [vmem:[#allocation5 + $0xd88] sm:$0xff] %v456_v49  ;;  %v458_v51 = vld [vmem:[#allocation2 + $0xd98] sm:$0xff] }
  0xed   :  { %1226 = vst.msk [vmem:[#allocation5 + $0xd90] sm:$0xff] %vm793_vm0, %v457_v50  ;;  %v459_v52 = vld [vmem:[#allocation2 + $0xda0] sm:$0xff]  ;;  %v460_v53 = vld [vmem:[#allocation2 + $0xda8] sm:$0xff]  ;;  %1227 = vst [vmem:[#allocation5 + $0xd98] sm:$0xff] %v458_v51 }
  0xee   :  { %1228 = vst [vmem:[#allocation5 + $0xda0] sm:$0xff] %v459_v52  ;;  %1229 = vst.msk [vmem:[#allocation5 + $0xda8] sm:$0xff] %vm793_vm0, %v460_v53  ;;  %v461_v54 = vld [vmem:[#allocation2 + $0xdb0] sm:$0xff]  ;;  %v462_v55 = vld [vmem:[#allocation2 + $0xdb8] sm:$0xff] }
  0xef   :  { %v463_v56 = vld [vmem:[#allocation2 + $0xdc0] sm:$0xff]  ;;  %1230 = vst [vmem:[#allocation5 + $0xdb0] sm:$0xff] %v461_v54  ;;  %1231 = vst [vmem:[#allocation5 + $0xdb8] sm:$0xff] %v462_v55  ;;  %v464_v57 = vld [vmem:[#allocation2 + $0xdc8] sm:$0xff] }
  0xf0   :  { %1232 = vst.msk [vmem:[#allocation5 + $0xdc0] sm:$0xff] %vm793_vm0, %v463_v56  ;;  %v465_v58 = vld [vmem:[#allocation2 + $0xdd0] sm:$0xff]  ;;  %v466_v59 = vld [vmem:[#allocation2 + $0xdd8] sm:$0xff]  ;;  %1233 = vst [vmem:[#allocation5 + $0xdc8] sm:$0xff] %v464_v57 }
  0xf1   :  { %1234 = vst [vmem:[#allocation5 + $0xdd0] sm:$0xff] %v465_v58  ;;  %1235 = vst.msk [vmem:[#allocation5 + $0xdd8] sm:$0xff] %vm793_vm0, %v466_v59  ;;  %v467_v60 = vld [vmem:[#allocation2 + $0xde0] sm:$0xff]  ;;  %v468_v61 = vld [vmem:[#allocation2 + $0xde8] sm:$0xff] }
  0xf2   :  { %v469_v62 = vld [vmem:[#allocation2 + $0xdf0] sm:$0xff]  ;;  %1236 = vst [vmem:[#allocation5 + $0xde0] sm:$0xff] %v467_v60  ;;  %1237 = vst [vmem:[#allocation5 + $0xde8] sm:$0xff] %v468_v61  ;;  %v470_v63 = vld [vmem:[#allocation2 + $0xdf8] sm:$0xff] }
  0xf3   :  { %1238 = vst.msk [vmem:[#allocation5 + $0xdf0] sm:$0xff] %vm793_vm0, %v469_v62  ;;  %v471_v0 = vld [vmem:[#allocation2 + $0xe00] sm:$0xff]  ;;  %v472_v1 = vld [vmem:[#allocation2 + $0xe08] sm:$0xff]  ;;  %1239 = vst [vmem:[#allocation5 + $0xdf8] sm:$0xff] %v470_v63 }
  0xf4   :  { %1240 = vst [vmem:[#allocation5 + $0xe00] sm:$0xff] %v471_v0  ;;  %1241 = vst.msk [vmem:[#allocation5 + $0xe08] sm:$0xff] %vm793_vm0, %v472_v1  ;;  %v473_v2 = vld [vmem:[#allocation2 + $0xe10] sm:$0xff]  ;;  %v474_v3 = vld [vmem:[#allocation2 + $0xe18] sm:$0xff] }
  0xf5   :  { %v475_v4 = vld [vmem:[#allocation2 + $0xe20] sm:$0xff]  ;;  %1242 = vst [vmem:[#allocation5 + $0xe10] sm:$0xff] %v473_v2  ;;  %1243 = vst [vmem:[#allocation5 + $0xe18] sm:$0xff] %v474_v3  ;;  %v476_v5 = vld [vmem:[#allocation2 + $0xe28] sm:$0xff] }
  0xf6   :  { %1244 = vst.msk [vmem:[#allocation5 + $0xe20] sm:$0xff] %vm793_vm0, %v475_v4  ;;  %v477_v6 = vld [vmem:[#allocation2 + $0xe30] sm:$0xff]  ;;  %v478_v7 = vld [vmem:[#allocation2 + $0xe38] sm:$0xff]  ;;  %1245 = vst [vmem:[#allocation5 + $0xe28] sm:$0xff] %v476_v5 }
  0xf7   :  { %1246 = vst [vmem:[#allocation5 + $0xe30] sm:$0xff] %v477_v6  ;;  %1247 = vst.msk [vmem:[#allocation5 + $0xe38] sm:$0xff] %vm793_vm0, %v478_v7  ;;  %v479_v8 = vld [vmem:[#allocation2 + $0xe40] sm:$0xff]  ;;  %v480_v9 = vld [vmem:[#allocation2 + $0xe48] sm:$0xff] }
  0xf8   :  { %v481_v10 = vld [vmem:[#allocation2 + $0xe50] sm:$0xff]  ;;  %1248 = vst [vmem:[#allocation5 + $0xe40] sm:$0xff] %v479_v8  ;;  %1249 = vst [vmem:[#allocation5 + $0xe48] sm:$0xff] %v480_v9  ;;  %v482_v11 = vld [vmem:[#allocation2 + $0xe58] sm:$0xff] }
  0xf9   :  { %1250 = vst.msk [vmem:[#allocation5 + $0xe50] sm:$0xff] %vm793_vm0, %v481_v10  ;;  %v483_v12 = vld [vmem:[#allocation2 + $0xe60] sm:$0xff]  ;;  %v484_v13 = vld [vmem:[#allocation2 + $0xe68] sm:$0xff]  ;;  %1251 = vst [vmem:[#allocation5 + $0xe58] sm:$0xff] %v482_v11 }
  0xfa   :  { %1252 = vst [vmem:[#allocation5 + $0xe60] sm:$0xff] %v483_v12  ;;  %1253 = vst.msk [vmem:[#allocation5 + $0xe68] sm:$0xff] %vm793_vm0, %v484_v13  ;;  %v485_v14 = vld [vmem:[#allocation2 + $0xe70] sm:$0xff]  ;;  %v486_v15 = vld [vmem:[#allocation2 + $0xe78] sm:$0xff] }
  0xfb   :  { %v487_v16 = vld [vmem:[#allocation2 + $0xe80] sm:$0xff]  ;;  %1254 = vst [vmem:[#allocation5 + $0xe70] sm:$0xff] %v485_v14  ;;  %1255 = vst [vmem:[#allocation5 + $0xe78] sm:$0xff] %v486_v15  ;;  %v488_v17 = vld [vmem:[#allocation2 + $0xe88] sm:$0xff] }
  0xfc   :  { %1256 = vst.msk [vmem:[#allocation5 + $0xe80] sm:$0xff] %vm793_vm0, %v487_v16  ;;  %v489_v18 = vld [vmem:[#allocation2 + $0xe90] sm:$0xff]  ;;  %v490_v19 = vld [vmem:[#allocation2 + $0xe98] sm:$0xff]  ;;  %1257 = vst [vmem:[#allocation5 + $0xe88] sm:$0xff] %v488_v17 }
  0xfd   :  { %1258 = vst [vmem:[#allocation5 + $0xe90] sm:$0xff] %v489_v18  ;;  %1259 = vst.msk [vmem:[#allocation5 + $0xe98] sm:$0xff] %vm793_vm0, %v490_v19  ;;  %v491_v20 = vld [vmem:[#allocation2 + $0xea0] sm:$0xff]  ;;  %v492_v21 = vld [vmem:[#allocation2 + $0xea8] sm:$0xff] }
  0xfe   :  { %v493_v22 = vld [vmem:[#allocation2 + $0xeb0] sm:$0xff]  ;;  %1260 = vst [vmem:[#allocation5 + $0xea0] sm:$0xff] %v491_v20  ;;  %1261 = vst [vmem:[#allocation5 + $0xea8] sm:$0xff] %v492_v21  ;;  %v494_v23 = vld [vmem:[#allocation2 + $0xeb8] sm:$0xff] }
  0xff   :  { %1262 = vst.msk [vmem:[#allocation5 + $0xeb0] sm:$0xff] %vm793_vm0, %v493_v22  ;;  %v495_v24 = vld [vmem:[#allocation2 + $0xec0] sm:$0xff]  ;;  %v496_v25 = vld [vmem:[#allocation2 + $0xec8] sm:$0xff]  ;;  %1263 = vst [vmem:[#allocation5 + $0xeb8] sm:$0xff] %v494_v23 }
 0x100   :  { %1264 = vst [vmem:[#allocation5 + $0xec0] sm:$0xff] %v495_v24  ;;  %1265 = vst.msk [vmem:[#allocation5 + $0xec8] sm:$0xff] %vm793_vm0, %v496_v25  ;;  %v497_v26 = vld [vmem:[#allocation2 + $0xed0] sm:$0xff]  ;;  %v498_v27 = vld [vmem:[#allocation2 + $0xed8] sm:$0xff] }
 0x101   :  { %v499_v28 = vld [vmem:[#allocation2 + $0xee0] sm:$0xff]  ;;  %1266 = vst [vmem:[#allocation5 + $0xed0] sm:$0xff] %v497_v26  ;;  %1267 = vst [vmem:[#allocation5 + $0xed8] sm:$0xff] %v498_v27  ;;  %v500_v29 = vld [vmem:[#allocation2 + $0xee8] sm:$0xff] }
 0x102   :  { %1268 = vst.msk [vmem:[#allocation5 + $0xee0] sm:$0xff] %vm793_vm0, %v499_v28  ;;  %v501_v30 = vld [vmem:[#allocation2 + $0xef0] sm:$0xff]  ;;  %v502_v31 = vld [vmem:[#allocation2 + $0xef8] sm:$0xff]  ;;  %1269 = vst [vmem:[#allocation5 + $0xee8] sm:$0xff] %v500_v29 }
 0x103   :  { %1270 = vst [vmem:[#allocation5 + $0xef0] sm:$0xff] %v501_v30  ;;  %1271 = vst.msk [vmem:[#allocation5 + $0xef8] sm:$0xff] %vm793_vm0, %v502_v31  ;;  %v503_v32 = vld [vmem:[#allocation2 + $0xf00] sm:$0xff]  ;;  %v504_v33 = vld [vmem:[#allocation2 + $0xf08] sm:$0xff] }
 0x104   :  { %v505_v34 = vld [vmem:[#allocation2 + $0xf10] sm:$0xff]  ;;  %1272 = vst [vmem:[#allocation5 + $0xf00] sm:$0xff] %v503_v32  ;;  %1273 = vst [vmem:[#allocation5 + $0xf08] sm:$0xff] %v504_v33  ;;  %v506_v35 = vld [vmem:[#allocation2 + $0xf18] sm:$0xff] }
 0x105   :  { %1274 = vst.msk [vmem:[#allocation5 + $0xf10] sm:$0xff] %vm793_vm0, %v505_v34  ;;  %v507_v36 = vld [vmem:[#allocation2 + $0xf20] sm:$0xff]  ;;  %v508_v37 = vld [vmem:[#allocation2 + $0xf28] sm:$0xff]  ;;  %1275 = vst [vmem:[#allocation5 + $0xf18] sm:$0xff] %v506_v35 }
 0x106   :  { %1276 = vst [vmem:[#allocation5 + $0xf20] sm:$0xff] %v507_v36  ;;  %1277 = vst.msk [vmem:[#allocation5 + $0xf28] sm:$0xff] %vm793_vm0, %v508_v37  ;;  %v509_v38 = vld [vmem:[#allocation2 + $0xf30] sm:$0xff]  ;;  %v510_v39 = vld [vmem:[#allocation2 + $0xf38] sm:$0xff] }
 0x107   :  { %v511_v40 = vld [vmem:[#allocation2 + $0xf40] sm:$0xff]  ;;  %1278 = vst [vmem:[#allocation5 + $0xf30] sm:$0xff] %v509_v38  ;;  %1279 = vst [vmem:[#allocation5 + $0xf38] sm:$0xff] %v510_v39  ;;  %v512_v41 = vld [vmem:[#allocation2 + $0xf48] sm:$0xff] }
 0x108   :  { %1280 = vst.msk [vmem:[#allocation5 + $0xf40] sm:$0xff] %vm793_vm0, %v511_v40  ;;  %v513_v42 = vld [vmem:[#allocation2 + $0xf50] sm:$0xff]  ;;  %v514_v43 = vld [vmem:[#allocation2 + $0xf58] sm:$0xff]  ;;  %1281 = vst [vmem:[#allocation5 + $0xf48] sm:$0xff] %v512_v41 }
 0x109   :  { %1282 = vst [vmem:[#allocation5 + $0xf50] sm:$0xff] %v513_v42  ;;  %1283 = vst.msk [vmem:[#allocation5 + $0xf58] sm:$0xff] %vm793_vm0, %v514_v43  ;;  %v515_v44 = vld [vmem:[#allocation2 + $0xf60] sm:$0xff]  ;;  %v516_v45 = vld [vmem:[#allocation2 + $0xf68] sm:$0xff] }
 0x10a   :  { %v517_v46 = vld [vmem:[#allocation2 + $0xf70] sm:$0xff]  ;;  %1284 = vst [vmem:[#allocation5 + $0xf60] sm:$0xff] %v515_v44  ;;  %1285 = vst [vmem:[#allocation5 + $0xf68] sm:$0xff] %v516_v45  ;;  %v518_v47 = vld [vmem:[#allocation2 + $0xf78] sm:$0xff] }
 0x10b   :  { %1286 = vst.msk [vmem:[#allocation5 + $0xf70] sm:$0xff] %vm793_vm0, %v517_v46  ;;  %v519_v48 = vld [vmem:[#allocation2 + $0xf80] sm:$0xff]  ;;  %v520_v49 = vld [vmem:[#allocation2 + $0xf88] sm:$0xff]  ;;  %1287 = vst [vmem:[#allocation5 + $0xf78] sm:$0xff] %v518_v47 }
 0x10c   :  { %1288 = vst [vmem:[#allocation5 + $0xf80] sm:$0xff] %v519_v48  ;;  %1289 = vst.msk [vmem:[#allocation5 + $0xf88] sm:$0xff] %vm793_vm0, %v520_v49  ;;  %v521_v50 = vld [vmem:[#allocation2 + $0xf90] sm:$0xff]  ;;  %v522_v51 = vld [vmem:[#allocation2 + $0xf98] sm:$0xff] }
 0x10d   :  { %v523_v52 = vld [vmem:[#allocation2 + $0xfa0] sm:$0xff]  ;;  %1290 = vst [vmem:[#allocation5 + $0xf90] sm:$0xff] %v521_v50  ;;  %1291 = vst [vmem:[#allocation5 + $0xf98] sm:$0xff] %v522_v51  ;;  %v524_v53 = vld [vmem:[#allocation2 + $0xfa8] sm:$0xff] }
 0x10e   :  { %1292 = vst.msk [vmem:[#allocation5 + $0xfa0] sm:$0xff] %vm793_vm0, %v523_v52  ;;  %v525_v54 = vld [vmem:[#allocation2 + $0xfb0] sm:$0xff]  ;;  %v526_v55 = vld [vmem:[#allocation2 + $0xfb8] sm:$0xff]  ;;  %1293 = vst [vmem:[#allocation5 + $0xfa8] sm:$0xff] %v524_v53 }
 0x10f   :  { %1294 = vst [vmem:[#allocation5 + $0xfb0] sm:$0xff] %v525_v54  ;;  %1295 = vst.msk [vmem:[#allocation5 + $0xfb8] sm:$0xff] %vm793_vm0, %v526_v55  ;;  %v527_v56 = vld [vmem:[#allocation2 + $0xfc0] sm:$0xff]  ;;  %v528_v57 = vld [vmem:[#allocation2 + $0xfc8] sm:$0xff] }
 0x110   :  { %v529_v58 = vld [vmem:[#allocation2 + $0xfd0] sm:$0xff]  ;;  %1296 = vst [vmem:[#allocation5 + $0xfc0] sm:$0xff] %v527_v56  ;;  %1297 = vst [vmem:[#allocation5 + $0xfc8] sm:$0xff] %v528_v57  ;;  %v530_v59 = vld [vmem:[#allocation2 + $0xfd8] sm:$0xff] }
 0x111   :  { %1298 = vst.msk [vmem:[#allocation5 + $0xfd0] sm:$0xff] %vm793_vm0, %v529_v58  ;;  %v531_v60 = vld [vmem:[#allocation2 + $0xfe0] sm:$0xff]  ;;  %v532_v61 = vld [vmem:[#allocation2 + $0xfe8] sm:$0xff]  ;;  %1299 = vst [vmem:[#allocation5 + $0xfd8] sm:$0xff] %v530_v59 }
 0x112   :  { %1300 = vst [vmem:[#allocation5 + $0xfe0] sm:$0xff] %v531_v60  ;;  %1301 = vst.msk [vmem:[#allocation5 + $0xfe8] sm:$0xff] %vm793_vm0, %v532_v61  ;;  %v533_v62 = vld [vmem:[#allocation2 + $0xff0] sm:$0xff]  ;;  %v534_v63 = vld [vmem:[#allocation2 + $0xff8] sm:$0xff] }
 0x113   :  { %v535_v0 = vld [vmem:[#allocation2 + $0x1000] sm:$0xff]  ;;  %1302 = vst [vmem:[#allocation5 + $0xff0] sm:$0xff] %v533_v62  ;;  %1303 = vst [vmem:[#allocation5 + $0xff8] sm:$0xff] %v534_v63  ;;  %v536_v1 = vld [vmem:[#allocation2 + $0x1008] sm:$0xff] }
 0x114   :  { %1304 = vst.msk [vmem:[#allocation5 + $0x1000] sm:$0xff] %vm793_vm0, %v535_v0  ;;  %v537_v2 = vld [vmem:[#allocation2 + $0x1010] sm:$0xff]  ;;  %v538_v3 = vld [vmem:[#allocation2 + $0x1018] sm:$0xff]  ;;  %1305 = vst [vmem:[#allocation5 + $0x1008] sm:$0xff] %v536_v1 }
 0x115   :  { %1306 = vst [vmem:[#allocation5 + $0x1010] sm:$0xff] %v537_v2  ;;  %1307 = vst.msk [vmem:[#allocation5 + $0x1018] sm:$0xff] %vm793_vm0, %v538_v3  ;;  %v539_v4 = vld [vmem:[#allocation2 + $0x1020] sm:$0xff]  ;;  %v540_v5 = vld [vmem:[#allocation2 + $0x1028] sm:$0xff] }
 0x116   :  { %v541_v6 = vld [vmem:[#allocation2 + $0x1030] sm:$0xff]  ;;  %1308 = vst [vmem:[#allocation5 + $0x1020] sm:$0xff] %v539_v4  ;;  %1309 = vst [vmem:[#allocation5 + $0x1028] sm:$0xff] %v540_v5  ;;  %v542_v7 = vld [vmem:[#allocation2 + $0x1038] sm:$0xff] }
 0x117   :  { %1310 = vst.msk [vmem:[#allocation5 + $0x1030] sm:$0xff] %vm793_vm0, %v541_v6  ;;  %v543_v8 = vld [vmem:[#allocation2 + $0x1040] sm:$0xff]  ;;  %v544_v9 = vld [vmem:[#allocation2 + $0x1048] sm:$0xff]  ;;  %1311 = vst [vmem:[#allocation5 + $0x1038] sm:$0xff] %v542_v7 }
 0x118   :  { %1312 = vst [vmem:[#allocation5 + $0x1040] sm:$0xff] %v543_v8  ;;  %1313 = vst.msk [vmem:[#allocation5 + $0x1048] sm:$0xff] %vm793_vm0, %v544_v9  ;;  %v545_v10 = vld [vmem:[#allocation2 + $0x1050] sm:$0xff]  ;;  %v546_v11 = vld [vmem:[#allocation2 + $0x1058] sm:$0xff] }
 0x119   :  { %v547_v12 = vld [vmem:[#allocation2 + $0x1060] sm:$0xff]  ;;  %1314 = vst [vmem:[#allocation5 + $0x1050] sm:$0xff] %v545_v10  ;;  %1315 = vst [vmem:[#allocation5 + $0x1058] sm:$0xff] %v546_v11  ;;  %v548_v13 = vld [vmem:[#allocation2 + $0x1068] sm:$0xff] }
 0x11a   :  { %1316 = vst.msk [vmem:[#allocation5 + $0x1060] sm:$0xff] %vm793_vm0, %v547_v12  ;;  %v549_v14 = vld [vmem:[#allocation2 + $0x1070] sm:$0xff]  ;;  %v550_v15 = vld [vmem:[#allocation2 + $0x1078] sm:$0xff]  ;;  %1317 = vst [vmem:[#allocation5 + $0x1068] sm:$0xff] %v548_v13 }
 0x11b   :  { %1318 = vst [vmem:[#allocation5 + $0x1070] sm:$0xff] %v549_v14  ;;  %1319 = vst.msk [vmem:[#allocation5 + $0x1078] sm:$0xff] %vm793_vm0, %v550_v15  ;;  %v551_v16 = vld [vmem:[#allocation2 + $0x1080] sm:$0xff]  ;;  %v552_v17 = vld [vmem:[#allocation2 + $0x1088] sm:$0xff] }
 0x11c   :  { %v553_v18 = vld [vmem:[#allocation2 + $0x1090] sm:$0xff]  ;;  %1320 = vst [vmem:[#allocation5 + $0x1080] sm:$0xff] %v551_v16  ;;  %1321 = vst [vmem:[#allocation5 + $0x1088] sm:$0xff] %v552_v17  ;;  %v554_v19 = vld [vmem:[#allocation2 + $0x1098] sm:$0xff] }
 0x11d   :  { %1322 = vst.msk [vmem:[#allocation5 + $0x1090] sm:$0xff] %vm793_vm0, %v553_v18  ;;  %v555_v20 = vld [vmem:[#allocation2 + $0x10a0] sm:$0xff]  ;;  %v556_v21 = vld [vmem:[#allocation2 + $0x10a8] sm:$0xff]  ;;  %1323 = vst [vmem:[#allocation5 + $0x1098] sm:$0xff] %v554_v19 }
 0x11e   :  { %1324 = vst [vmem:[#allocation5 + $0x10a0] sm:$0xff] %v555_v20  ;;  %1325 = vst.msk [vmem:[#allocation5 + $0x10a8] sm:$0xff] %vm793_vm0, %v556_v21  ;;  %v557_v22 = vld [vmem:[#allocation2 + $0x10b0] sm:$0xff]  ;;  %v558_v23 = vld [vmem:[#allocation2 + $0x10b8] sm:$0xff] }
 0x11f   :  { %v559_v24 = vld [vmem:[#allocation2 + $0x10c0] sm:$0xff]  ;;  %1326 = vst [vmem:[#allocation5 + $0x10b0] sm:$0xff] %v557_v22  ;;  %1327 = vst [vmem:[#allocation5 + $0x10b8] sm:$0xff] %v558_v23  ;;  %v560_v25 = vld [vmem:[#allocation2 + $0x10c8] sm:$0xff] }
 0x120   :  { %1328 = vst.msk [vmem:[#allocation5 + $0x10c0] sm:$0xff] %vm793_vm0, %v559_v24  ;;  %v561_v26 = vld [vmem:[#allocation2 + $0x10d0] sm:$0xff]  ;;  %v562_v27 = vld [vmem:[#allocation2 + $0x10d8] sm:$0xff]  ;;  %1329 = vst [vmem:[#allocation5 + $0x10c8] sm:$0xff] %v560_v25 }
 0x121   :  { %1330 = vst [vmem:[#allocation5 + $0x10d0] sm:$0xff] %v561_v26  ;;  %1331 = vst.msk [vmem:[#allocation5 + $0x10d8] sm:$0xff] %vm793_vm0, %v562_v27  ;;  %v563_v28 = vld [vmem:[#allocation2 + $0x10e0] sm:$0xff]  ;;  %v564_v29 = vld [vmem:[#allocation2 + $0x10e8] sm:$0xff] }
 0x122   :  { %v565_v30 = vld [vmem:[#allocation2 + $0x10f0] sm:$0xff]  ;;  %1332 = vst [vmem:[#allocation5 + $0x10e0] sm:$0xff] %v563_v28  ;;  %1333 = vst [vmem:[#allocation5 + $0x10e8] sm:$0xff] %v564_v29  ;;  %v566_v31 = vld [vmem:[#allocation2 + $0x10f8] sm:$0xff] }
 0x123   :  { %1334 = vst.msk [vmem:[#allocation5 + $0x10f0] sm:$0xff] %vm793_vm0, %v565_v30  ;;  %v567_v32 = vld [vmem:[#allocation2 + $0x1100] sm:$0xff]  ;;  %v568_v33 = vld [vmem:[#allocation2 + $0x1108] sm:$0xff]  ;;  %1335 = vst [vmem:[#allocation5 + $0x10f8] sm:$0xff] %v566_v31 }
 0x124   :  { %1336 = vst [vmem:[#allocation5 + $0x1100] sm:$0xff] %v567_v32  ;;  %1337 = vst.msk [vmem:[#allocation5 + $0x1108] sm:$0xff] %vm793_vm0, %v568_v33  ;;  %v569_v34 = vld [vmem:[#allocation2 + $0x1110] sm:$0xff]  ;;  %v570_v35 = vld [vmem:[#allocation2 + $0x1118] sm:$0xff] }
 0x125   :  { %v571_v36 = vld [vmem:[#allocation2 + $0x1120] sm:$0xff]  ;;  %1338 = vst [vmem:[#allocation5 + $0x1110] sm:$0xff] %v569_v34  ;;  %1339 = vst [vmem:[#allocation5 + $0x1118] sm:$0xff] %v570_v35  ;;  %v572_v37 = vld [vmem:[#allocation2 + $0x1128] sm:$0xff] }
 0x126   :  { %1340 = vst.msk [vmem:[#allocation5 + $0x1120] sm:$0xff] %vm793_vm0, %v571_v36  ;;  %v573_v38 = vld [vmem:[#allocation2 + $0x1130] sm:$0xff]  ;;  %v574_v39 = vld [vmem:[#allocation2 + $0x1138] sm:$0xff]  ;;  %1341 = vst [vmem:[#allocation5 + $0x1128] sm:$0xff] %v572_v37 }
 0x127   :  { %1342 = vst [vmem:[#allocation5 + $0x1130] sm:$0xff] %v573_v38  ;;  %1343 = vst.msk [vmem:[#allocation5 + $0x1138] sm:$0xff] %vm793_vm0, %v574_v39  ;;  %v575_v40 = vld [vmem:[#allocation2 + $0x1140] sm:$0xff]  ;;  %v576_v41 = vld [vmem:[#allocation2 + $0x1148] sm:$0xff] }
 0x128   :  { %v577_v42 = vld [vmem:[#allocation2 + $0x1150] sm:$0xff]  ;;  %1344 = vst [vmem:[#allocation5 + $0x1140] sm:$0xff] %v575_v40  ;;  %1345 = vst [vmem:[#allocation5 + $0x1148] sm:$0xff] %v576_v41  ;;  %v578_v43 = vld [vmem:[#allocation2 + $0x1158] sm:$0xff] }
 0x129   :  { %1346 = vst.msk [vmem:[#allocation5 + $0x1150] sm:$0xff] %vm793_vm0, %v577_v42  ;;  %v579_v44 = vld [vmem:[#allocation2 + $0x1160] sm:$0xff]  ;;  %v580_v45 = vld [vmem:[#allocation2 + $0x1168] sm:$0xff]  ;;  %1347 = vst [vmem:[#allocation5 + $0x1158] sm:$0xff] %v578_v43 }
 0x12a   :  { %1348 = vst [vmem:[#allocation5 + $0x1160] sm:$0xff] %v579_v44  ;;  %1349 = vst.msk [vmem:[#allocation5 + $0x1168] sm:$0xff] %vm793_vm0, %v580_v45  ;;  %v581_v46 = vld [vmem:[#allocation2 + $0x1170] sm:$0xff]  ;;  %v582_v47 = vld [vmem:[#allocation2 + $0x1178] sm:$0xff] }
 0x12b   :  { %v583_v48 = vld [vmem:[#allocation2 + $0x1180] sm:$0xff]  ;;  %1350 = vst [vmem:[#allocation5 + $0x1170] sm:$0xff] %v581_v46  ;;  %1351 = vst [vmem:[#allocation5 + $0x1178] sm:$0xff] %v582_v47  ;;  %v584_v49 = vld [vmem:[#allocation2 + $0x1188] sm:$0xff] }
 0x12c   :  { %1352 = vst.msk [vmem:[#allocation5 + $0x1180] sm:$0xff] %vm793_vm0, %v583_v48  ;;  %v585_v50 = vld [vmem:[#allocation2 + $0x1190] sm:$0xff]  ;;  %v586_v51 = vld [vmem:[#allocation2 + $0x1198] sm:$0xff]  ;;  %1353 = vst [vmem:[#allocation5 + $0x1188] sm:$0xff] %v584_v49 }
 0x12d   :  { %1354 = vst [vmem:[#allocation5 + $0x1190] sm:$0xff] %v585_v50  ;;  %1355 = vst.msk [vmem:[#allocation5 + $0x1198] sm:$0xff] %vm793_vm0, %v586_v51  ;;  %v587_v52 = vld [vmem:[#allocation2 + $0x11a0] sm:$0xff]  ;;  %v588_v53 = vld [vmem:[#allocation2 + $0x11a8] sm:$0xff] }
 0x12e   :  { %v589_v54 = vld [vmem:[#allocation2 + $0x11b0] sm:$0xff]  ;;  %1356 = vst [vmem:[#allocation5 + $0x11a0] sm:$0xff] %v587_v52  ;;  %1357 = vst [vmem:[#allocation5 + $0x11a8] sm:$0xff] %v588_v53  ;;  %v590_v55 = vld [vmem:[#allocation2 + $0x11b8] sm:$0xff] }
 0x12f   :  { %1358 = vst.msk [vmem:[#allocation5 + $0x11b0] sm:$0xff] %vm793_vm0, %v589_v54  ;;  %v591_v56 = vld [vmem:[#allocation2 + $0x11c0] sm:$0xff]  ;;  %v592_v57 = vld [vmem:[#allocation2 + $0x11c8] sm:$0xff]  ;;  %1359 = vst [vmem:[#allocation5 + $0x11b8] sm:$0xff] %v590_v55 }
 0x130   :  { %1360 = vst [vmem:[#allocation5 + $0x11c0] sm:$0xff] %v591_v56  ;;  %1361 = vst.msk [vmem:[#allocation5 + $0x11c8] sm:$0xff] %vm793_vm0, %v592_v57  ;;  %v593_v58 = vld [vmem:[#allocation2 + $0x11d0] sm:$0xff]  ;;  %v594_v59 = vld [vmem:[#allocation2 + $0x11d8] sm:$0xff] }
 0x131   :  { %v595_v60 = vld [vmem:[#allocation2 + $0x11e0] sm:$0xff]  ;;  %1362 = vst [vmem:[#allocation5 + $0x11d0] sm:$0xff] %v593_v58  ;;  %1363 = vst [vmem:[#allocation5 + $0x11d8] sm:$0xff] %v594_v59  ;;  %v596_v61 = vld [vmem:[#allocation2 + $0x11e8] sm:$0xff] }
 0x132   :  { %1364 = vst.msk [vmem:[#allocation5 + $0x11e0] sm:$0xff] %vm793_vm0, %v595_v60  ;;  %v597_v62 = vld [vmem:[#allocation2 + $0x11f0] sm:$0xff]  ;;  %v598_v63 = vld [vmem:[#allocation2 + $0x11f8] sm:$0xff]  ;;  %1365 = vst [vmem:[#allocation5 + $0x11e8] sm:$0xff] %v596_v61 }
 0x133   :  { %1366 = vst [vmem:[#allocation5 + $0x11f0] sm:$0xff] %v597_v62  ;;  %1367 = vst.msk [vmem:[#allocation5 + $0x11f8] sm:$0xff] %vm793_vm0, %v598_v63  ;;  %v599_v0 = vld [vmem:[#allocation2 + $0x1200] sm:$0xff]  ;;  %v600_v1 = vld [vmem:[#allocation2 + $0x1208] sm:$0xff] }
 0x134   :  { %v601_v2 = vld [vmem:[#allocation2 + $0x1210] sm:$0xff]  ;;  %1368 = vst [vmem:[#allocation5 + $0x1200] sm:$0xff] %v599_v0  ;;  %1369 = vst [vmem:[#allocation5 + $0x1208] sm:$0xff] %v600_v1  ;;  %v602_v3 = vld [vmem:[#allocation2 + $0x1218] sm:$0xff] }
 0x135   :  { %1370 = vst.msk [vmem:[#allocation5 + $0x1210] sm:$0xff] %vm793_vm0, %v601_v2  ;;  %v603_v4 = vld [vmem:[#allocation2 + $0x1220] sm:$0xff]  ;;  %v604_v5 = vld [vmem:[#allocation2 + $0x1228] sm:$0xff]  ;;  %1371 = vst [vmem:[#allocation5 + $0x1218] sm:$0xff] %v602_v3 }
 0x136   :  { %1372 = vst [vmem:[#allocation5 + $0x1220] sm:$0xff] %v603_v4  ;;  %1373 = vst.msk [vmem:[#allocation5 + $0x1228] sm:$0xff] %vm793_vm0, %v604_v5  ;;  %v605_v6 = vld [vmem:[#allocation2 + $0x1230] sm:$0xff]  ;;  %v606_v7 = vld [vmem:[#allocation2 + $0x1238] sm:$0xff] }
 0x137   :  { %v607_v8 = vld [vmem:[#allocation2 + $0x1240] sm:$0xff]  ;;  %1374 = vst [vmem:[#allocation5 + $0x1230] sm:$0xff] %v605_v6  ;;  %1375 = vst [vmem:[#allocation5 + $0x1238] sm:$0xff] %v606_v7  ;;  %v608_v9 = vld [vmem:[#allocation2 + $0x1248] sm:$0xff] }
 0x138   :  { %1376 = vst.msk [vmem:[#allocation5 + $0x1240] sm:$0xff] %vm793_vm0, %v607_v8  ;;  %v609_v10 = vld [vmem:[#allocation2 + $0x1250] sm:$0xff]  ;;  %v610_v11 = vld [vmem:[#allocation2 + $0x1258] sm:$0xff]  ;;  %1377 = vst [vmem:[#allocation5 + $0x1248] sm:$0xff] %v608_v9 }
 0x139   :  { %1378 = vst [vmem:[#allocation5 + $0x1250] sm:$0xff] %v609_v10  ;;  %1379 = vst.msk [vmem:[#allocation5 + $0x1258] sm:$0xff] %vm793_vm0, %v610_v11  ;;  %v611_v12 = vld [vmem:[#allocation2 + $0x1260] sm:$0xff]  ;;  %v612_v13 = vld [vmem:[#allocation2 + $0x1268] sm:$0xff] }
 0x13a   :  { %v613_v14 = vld [vmem:[#allocation2 + $0x1270] sm:$0xff]  ;;  %1380 = vst [vmem:[#allocation5 + $0x1260] sm:$0xff] %v611_v12  ;;  %1381 = vst [vmem:[#allocation5 + $0x1268] sm:$0xff] %v612_v13  ;;  %v614_v15 = vld [vmem:[#allocation2 + $0x1278] sm:$0xff] }
 0x13b   :  { %1382 = vst.msk [vmem:[#allocation5 + $0x1270] sm:$0xff] %vm793_vm0, %v613_v14  ;;  %v615_v16 = vld [vmem:[#allocation2 + $0x1280] sm:$0xff]  ;;  %v616_v17 = vld [vmem:[#allocation2 + $0x1288] sm:$0xff]  ;;  %1383 = vst [vmem:[#allocation5 + $0x1278] sm:$0xff] %v614_v15 }
 0x13c   :  { %1384 = vst [vmem:[#allocation5 + $0x1280] sm:$0xff] %v615_v16  ;;  %1385 = vst.msk [vmem:[#allocation5 + $0x1288] sm:$0xff] %vm793_vm0, %v616_v17  ;;  %v617_v18 = vld [vmem:[#allocation2 + $0x1290] sm:$0xff]  ;;  %v618_v19 = vld [vmem:[#allocation2 + $0x1298] sm:$0xff] }
 0x13d   :  { %v619_v20 = vld [vmem:[#allocation2 + $0x12a0] sm:$0xff]  ;;  %1386 = vst [vmem:[#allocation5 + $0x1290] sm:$0xff] %v617_v18  ;;  %1387 = vst [vmem:[#allocation5 + $0x1298] sm:$0xff] %v618_v19  ;;  %v620_v21 = vld [vmem:[#allocation2 + $0x12a8] sm:$0xff] }
 0x13e   :  { %1388 = vst.msk [vmem:[#allocation5 + $0x12a0] sm:$0xff] %vm793_vm0, %v619_v20  ;;  %v621_v22 = vld [vmem:[#allocation2 + $0x12b0] sm:$0xff]  ;;  %v622_v23 = vld [vmem:[#allocation2 + $0x12b8] sm:$0xff]  ;;  %1389 = vst [vmem:[#allocation5 + $0x12a8] sm:$0xff] %v620_v21 }
 0x13f   :  { %1390 = vst [vmem:[#allocation5 + $0x12b0] sm:$0xff] %v621_v22  ;;  %1391 = vst.msk [vmem:[#allocation5 + $0x12b8] sm:$0xff] %vm793_vm0, %v622_v23  ;;  %v623_v24 = vld [vmem:[#allocation2 + $0x12c0] sm:$0xff]  ;;  %v624_v25 = vld [vmem:[#allocation2 + $0x12c8] sm:$0xff] }
 0x140   :  { %v625_v26 = vld [vmem:[#allocation2 + $0x12d0] sm:$0xff]  ;;  %1392 = vst [vmem:[#allocation5 + $0x12c0] sm:$0xff] %v623_v24  ;;  %1393 = vst [vmem:[#allocation5 + $0x12c8] sm:$0xff] %v624_v25  ;;  %v626_v27 = vld [vmem:[#allocation2 + $0x12d8] sm:$0xff] }
 0x141   :  { %1394 = vst.msk [vmem:[#allocation5 + $0x12d0] sm:$0xff] %vm793_vm0, %v625_v26  ;;  %v627_v28 = vld [vmem:[#allocation2 + $0x12e0] sm:$0xff]  ;;  %v628_v29 = vld [vmem:[#allocation2 + $0x12e8] sm:$0xff]  ;;  %1395 = vst [vmem:[#allocation5 + $0x12d8] sm:$0xff] %v626_v27 }
 0x142   :  { %1396 = vst [vmem:[#allocation5 + $0x12e0] sm:$0xff] %v627_v28  ;;  %1397 = vst.msk [vmem:[#allocation5 + $0x12e8] sm:$0xff] %vm793_vm0, %v628_v29  ;;  %v629_v30 = vld [vmem:[#allocation2 + $0x12f0] sm:$0xff]  ;;  %v630_v31 = vld [vmem:[#allocation2 + $0x12f8] sm:$0xff] }
 0x143   :  { %v631_v32 = vld [vmem:[#allocation2 + $0x1300] sm:$0xff]  ;;  %1398 = vst [vmem:[#allocation5 + $0x12f0] sm:$0xff] %v629_v30  ;;  %1399 = vst [vmem:[#allocation5 + $0x12f8] sm:$0xff] %v630_v31  ;;  %v632_v33 = vld [vmem:[#allocation2 + $0x1308] sm:$0xff] }
 0x144   :  { %1400 = vst.msk [vmem:[#allocation5 + $0x1300] sm:$0xff] %vm793_vm0, %v631_v32  ;;  %v633_v34 = vld [vmem:[#allocation2 + $0x1310] sm:$0xff]  ;;  %v634_v35 = vld [vmem:[#allocation2 + $0x1318] sm:$0xff]  ;;  %1401 = vst [vmem:[#allocation5 + $0x1308] sm:$0xff] %v632_v33 }
 0x145   :  { %1402 = vst [vmem:[#allocation5 + $0x1310] sm:$0xff] %v633_v34  ;;  %1403 = vst.msk [vmem:[#allocation5 + $0x1318] sm:$0xff] %vm793_vm0, %v634_v35  ;;  %v635_v36 = vld [vmem:[#allocation2 + $0x1320] sm:$0xff]  ;;  %v636_v37 = vld [vmem:[#allocation2 + $0x1328] sm:$0xff] }
 0x146   :  { %v637_v38 = vld [vmem:[#allocation2 + $0x1330] sm:$0xff]  ;;  %1404 = vst [vmem:[#allocation5 + $0x1320] sm:$0xff] %v635_v36  ;;  %1405 = vst [vmem:[#allocation5 + $0x1328] sm:$0xff] %v636_v37  ;;  %v638_v39 = vld [vmem:[#allocation2 + $0x1338] sm:$0xff] }
 0x147   :  { %1406 = vst.msk [vmem:[#allocation5 + $0x1330] sm:$0xff] %vm793_vm0, %v637_v38  ;;  %v639_v40 = vld [vmem:[#allocation2 + $0x1340] sm:$0xff]  ;;  %v640_v41 = vld [vmem:[#allocation2 + $0x1348] sm:$0xff]  ;;  %1407 = vst [vmem:[#allocation5 + $0x1338] sm:$0xff] %v638_v39 }
 0x148   :  { %1408 = vst [vmem:[#allocation5 + $0x1340] sm:$0xff] %v639_v40  ;;  %1409 = vst.msk [vmem:[#allocation5 + $0x1348] sm:$0xff] %vm793_vm0, %v640_v41  ;;  %v641_v42 = vld [vmem:[#allocation2 + $0x1350] sm:$0xff]  ;;  %v642_v43 = vld [vmem:[#allocation2 + $0x1358] sm:$0xff] }
 0x149   :  { %v643_v44 = vld [vmem:[#allocation2 + $0x1360] sm:$0xff]  ;;  %1410 = vst [vmem:[#allocation5 + $0x1350] sm:$0xff] %v641_v42  ;;  %1411 = vst [vmem:[#allocation5 + $0x1358] sm:$0xff] %v642_v43  ;;  %v644_v45 = vld [vmem:[#allocation2 + $0x1368] sm:$0xff] }
 0x14a   :  { %1412 = vst.msk [vmem:[#allocation5 + $0x1360] sm:$0xff] %vm793_vm0, %v643_v44  ;;  %v645_v46 = vld [vmem:[#allocation2 + $0x1370] sm:$0xff]  ;;  %v646_v47 = vld [vmem:[#allocation2 + $0x1378] sm:$0xff]  ;;  %1413 = vst [vmem:[#allocation5 + $0x1368] sm:$0xff] %v644_v45 }
 0x14b   :  { %1414 = vst [vmem:[#allocation5 + $0x1370] sm:$0xff] %v645_v46  ;;  %1415 = vst.msk [vmem:[#allocation5 + $0x1378] sm:$0xff] %vm793_vm0, %v646_v47  ;;  %v647_v48 = vld [vmem:[#allocation2 + $0x1380] sm:$0xff]  ;;  %v648_v49 = vld [vmem:[#allocation2 + $0x1388] sm:$0xff] }
 0x14c   :  { %v649_v50 = vld [vmem:[#allocation2 + $0x1390] sm:$0xff]  ;;  %1416 = vst [vmem:[#allocation5 + $0x1380] sm:$0xff] %v647_v48  ;;  %1417 = vst [vmem:[#allocation5 + $0x1388] sm:$0xff] %v648_v49  ;;  %v650_v51 = vld [vmem:[#allocation2 + $0x1398] sm:$0xff] }
 0x14d   :  { %1418 = vst.msk [vmem:[#allocation5 + $0x1390] sm:$0xff] %vm793_vm0, %v649_v50  ;;  %v651_v52 = vld [vmem:[#allocation2 + $0x13a0] sm:$0xff]  ;;  %v652_v53 = vld [vmem:[#allocation2 + $0x13a8] sm:$0xff]  ;;  %1419 = vst [vmem:[#allocation5 + $0x1398] sm:$0xff] %v650_v51 }
 0x14e   :  { %1420 = vst [vmem:[#allocation5 + $0x13a0] sm:$0xff] %v651_v52  ;;  %1421 = vst.msk [vmem:[#allocation5 + $0x13a8] sm:$0xff] %vm793_vm0, %v652_v53  ;;  %v653_v54 = vld [vmem:[#allocation2 + $0x13b0] sm:$0xff]  ;;  %v654_v55 = vld [vmem:[#allocation2 + $0x13b8] sm:$0xff] }
 0x14f   :  { %v655_v56 = vld [vmem:[#allocation2 + $0x13c0] sm:$0xff]  ;;  %1422 = vst [vmem:[#allocation5 + $0x13b0] sm:$0xff] %v653_v54  ;;  %1423 = vst [vmem:[#allocation5 + $0x13b8] sm:$0xff] %v654_v55  ;;  %v656_v57 = vld [vmem:[#allocation2 + $0x13c8] sm:$0xff] }
 0x150   :  { %1424 = vst.msk [vmem:[#allocation5 + $0x13c0] sm:$0xff] %vm793_vm0, %v655_v56  ;;  %v657_v58 = vld [vmem:[#allocation2 + $0x13d0] sm:$0xff]  ;;  %v658_v59 = vld [vmem:[#allocation2 + $0x13d8] sm:$0xff]  ;;  %1425 = vst [vmem:[#allocation5 + $0x13c8] sm:$0xff] %v656_v57 }
 0x151   :  { %1426 = vst [vmem:[#allocation5 + $0x13d0] sm:$0xff] %v657_v58  ;;  %1427 = vst.msk [vmem:[#allocation5 + $0x13d8] sm:$0xff] %vm793_vm0, %v658_v59  ;;  %v659_v60 = vld [vmem:[#allocation2 + $0x13e0] sm:$0xff]  ;;  %v660_v61 = vld [vmem:[#allocation2 + $0x13e8] sm:$0xff] }
 0x152   :  { %v661_v62 = vld [vmem:[#allocation2 + $0x13f0] sm:$0xff]  ;;  %1428 = vst [vmem:[#allocation5 + $0x13e0] sm:$0xff] %v659_v60  ;;  %1429 = vst [vmem:[#allocation5 + $0x13e8] sm:$0xff] %v660_v61  ;;  %v662_v63 = vld [vmem:[#allocation2 + $0x13f8] sm:$0xff] }
 0x153   :  { %1430 = vst.msk [vmem:[#allocation5 + $0x13f0] sm:$0xff] %vm793_vm0, %v661_v62  ;;  %v663_v0 = vld [vmem:[#allocation2 + $0x1400] sm:$0xff]  ;;  %v664_v1 = vld [vmem:[#allocation2 + $0x1408] sm:$0xff]  ;;  %1431 = vst [vmem:[#allocation5 + $0x13f8] sm:$0xff] %v662_v63 }
 0x154   :  { %1432 = vst [vmem:[#allocation5 + $0x1400] sm:$0xff] %v663_v0  ;;  %1433 = vst.msk [vmem:[#allocation5 + $0x1408] sm:$0xff] %vm793_vm0, %v664_v1  ;;  %v665_v2 = vld [vmem:[#allocation2 + $0x1410] sm:$0xff]  ;;  %v666_v3 = vld [vmem:[#allocation2 + $0x1418] sm:$0xff] }
 0x155   :  { %v667_v4 = vld [vmem:[#allocation2 + $0x1420] sm:$0xff]  ;;  %1434 = vst [vmem:[#allocation5 + $0x1410] sm:$0xff] %v665_v2  ;;  %1435 = vst [vmem:[#allocation5 + $0x1418] sm:$0xff] %v666_v3  ;;  %v668_v5 = vld [vmem:[#allocation2 + $0x1428] sm:$0xff] }
 0x156   :  { %1436 = vst.msk [vmem:[#allocation5 + $0x1420] sm:$0xff] %vm793_vm0, %v667_v4  ;;  %v669_v6 = vld [vmem:[#allocation2 + $0x1430] sm:$0xff]  ;;  %v670_v7 = vld [vmem:[#allocation2 + $0x1438] sm:$0xff]  ;;  %1437 = vst [vmem:[#allocation5 + $0x1428] sm:$0xff] %v668_v5 }
 0x157   :  { %1438 = vst [vmem:[#allocation5 + $0x1430] sm:$0xff] %v669_v6  ;;  %1439 = vst.msk [vmem:[#allocation5 + $0x1438] sm:$0xff] %vm793_vm0, %v670_v7  ;;  %v671_v8 = vld [vmem:[#allocation2 + $0x1440] sm:$0xff]  ;;  %v672_v9 = vld [vmem:[#allocation2 + $0x1448] sm:$0xff] }
 0x158   :  { %v673_v10 = vld [vmem:[#allocation2 + $0x1450] sm:$0xff]  ;;  %1440 = vst [vmem:[#allocation5 + $0x1440] sm:$0xff] %v671_v8  ;;  %1441 = vst [vmem:[#allocation5 + $0x1448] sm:$0xff] %v672_v9  ;;  %v674_v11 = vld [vmem:[#allocation2 + $0x1458] sm:$0xff] }
 0x159   :  { %1442 = vst.msk [vmem:[#allocation5 + $0x1450] sm:$0xff] %vm793_vm0, %v673_v10  ;;  %v675_v12 = vld [vmem:[#allocation2 + $0x1460] sm:$0xff]  ;;  %v676_v13 = vld [vmem:[#allocation2 + $0x1468] sm:$0xff]  ;;  %1443 = vst [vmem:[#allocation5 + $0x1458] sm:$0xff] %v674_v11 }
 0x15a   :  { %1444 = vst [vmem:[#allocation5 + $0x1460] sm:$0xff] %v675_v12  ;;  %1445 = vst.msk [vmem:[#allocation5 + $0x1468] sm:$0xff] %vm793_vm0, %v676_v13  ;;  %v677_v14 = vld [vmem:[#allocation2 + $0x1470] sm:$0xff]  ;;  %v678_v15 = vld [vmem:[#allocation2 + $0x1478] sm:$0xff] }
 0x15b   :  { %v679_v16 = vld [vmem:[#allocation2 + $0x1480] sm:$0xff]  ;;  %1446 = vst [vmem:[#allocation5 + $0x1470] sm:$0xff] %v677_v14  ;;  %1447 = vst [vmem:[#allocation5 + $0x1478] sm:$0xff] %v678_v15  ;;  %v680_v17 = vld [vmem:[#allocation2 + $0x1488] sm:$0xff] }
 0x15c   :  { %1448 = vst.msk [vmem:[#allocation5 + $0x1480] sm:$0xff] %vm793_vm0, %v679_v16  ;;  %v681_v18 = vld [vmem:[#allocation2 + $0x1490] sm:$0xff]  ;;  %v682_v19 = vld [vmem:[#allocation2 + $0x1498] sm:$0xff]  ;;  %1449 = vst [vmem:[#allocation5 + $0x1488] sm:$0xff] %v680_v17 }
 0x15d   :  { %1450 = vst [vmem:[#allocation5 + $0x1490] sm:$0xff] %v681_v18  ;;  %1451 = vst.msk [vmem:[#allocation5 + $0x1498] sm:$0xff] %vm793_vm0, %v682_v19  ;;  %v683_v20 = vld [vmem:[#allocation2 + $0x14a0] sm:$0xff]  ;;  %v684_v21 = vld [vmem:[#allocation2 + $0x14a8] sm:$0xff] }
 0x15e   :  { %v685_v22 = vld [vmem:[#allocation2 + $0x14b0] sm:$0xff]  ;;  %1452 = vst [vmem:[#allocation5 + $0x14a0] sm:$0xff] %v683_v20  ;;  %1453 = vst [vmem:[#allocation5 + $0x14a8] sm:$0xff] %v684_v21  ;;  %v686_v23 = vld [vmem:[#allocation2 + $0x14b8] sm:$0xff] }
 0x15f   :  { %1454 = vst.msk [vmem:[#allocation5 + $0x14b0] sm:$0xff] %vm793_vm0, %v685_v22  ;;  %v687_v24 = vld [vmem:[#allocation2 + $0x14c0] sm:$0xff]  ;;  %v688_v25 = vld [vmem:[#allocation2 + $0x14c8] sm:$0xff]  ;;  %1455 = vst [vmem:[#allocation5 + $0x14b8] sm:$0xff] %v686_v23 }
 0x160   :  { %1456 = vst [vmem:[#allocation5 + $0x14c0] sm:$0xff] %v687_v24  ;;  %1457 = vst.msk [vmem:[#allocation5 + $0x14c8] sm:$0xff] %vm793_vm0, %v688_v25  ;;  %v689_v26 = vld [vmem:[#allocation2 + $0x14d0] sm:$0xff]  ;;  %v690_v27 = vld [vmem:[#allocation2 + $0x14d8] sm:$0xff] }
 0x161   :  { %v691_v28 = vld [vmem:[#allocation2 + $0x14e0] sm:$0xff]  ;;  %1458 = vst [vmem:[#allocation5 + $0x14d0] sm:$0xff] %v689_v26  ;;  %1459 = vst [vmem:[#allocation5 + $0x14d8] sm:$0xff] %v690_v27  ;;  %v692_v29 = vld [vmem:[#allocation2 + $0x14e8] sm:$0xff] }
 0x162   :  { %1460 = vst.msk [vmem:[#allocation5 + $0x14e0] sm:$0xff] %vm793_vm0, %v691_v28  ;;  %v693_v30 = vld [vmem:[#allocation2 + $0x14f0] sm:$0xff]  ;;  %v694_v31 = vld [vmem:[#allocation2 + $0x14f8] sm:$0xff]  ;;  %1461 = vst [vmem:[#allocation5 + $0x14e8] sm:$0xff] %v692_v29 }
 0x163   :  { %1462 = vst [vmem:[#allocation5 + $0x14f0] sm:$0xff] %v693_v30  ;;  %1463 = vst.msk [vmem:[#allocation5 + $0x14f8] sm:$0xff] %vm793_vm0, %v694_v31  ;;  %v695_v32 = vld [vmem:[#allocation2 + $0x1500] sm:$0xff]  ;;  %v696_v33 = vld [vmem:[#allocation2 + $0x1508] sm:$0xff] }
 0x164   :  { %v697_v34 = vld [vmem:[#allocation2 + $0x1510] sm:$0xff]  ;;  %1464 = vst [vmem:[#allocation5 + $0x1500] sm:$0xff] %v695_v32  ;;  %1465 = vst [vmem:[#allocation5 + $0x1508] sm:$0xff] %v696_v33  ;;  %v698_v35 = vld [vmem:[#allocation2 + $0x1518] sm:$0xff] }
 0x165   :  { %1466 = vst.msk [vmem:[#allocation5 + $0x1510] sm:$0xff] %vm793_vm0, %v697_v34  ;;  %v699_v36 = vld [vmem:[#allocation2 + $0x1520] sm:$0xff]  ;;  %v700_v37 = vld [vmem:[#allocation2 + $0x1528] sm:$0xff]  ;;  %1467 = vst [vmem:[#allocation5 + $0x1518] sm:$0xff] %v698_v35 }
 0x166   :  { %1468 = vst [vmem:[#allocation5 + $0x1520] sm:$0xff] %v699_v36  ;;  %1469 = vst.msk [vmem:[#allocation5 + $0x1528] sm:$0xff] %vm793_vm0, %v700_v37  ;;  %v701_v38 = vld [vmem:[#allocation2 + $0x1530] sm:$0xff]  ;;  %v702_v39 = vld [vmem:[#allocation2 + $0x1538] sm:$0xff] }
 0x167   :  { %v703_v40 = vld [vmem:[#allocation2 + $0x1540] sm:$0xff]  ;;  %1470 = vst [vmem:[#allocation5 + $0x1530] sm:$0xff] %v701_v38  ;;  %1471 = vst [vmem:[#allocation5 + $0x1538] sm:$0xff] %v702_v39  ;;  %v704_v41 = vld [vmem:[#allocation2 + $0x1548] sm:$0xff] }
 0x168   :  { %1472 = vst.msk [vmem:[#allocation5 + $0x1540] sm:$0xff] %vm793_vm0, %v703_v40  ;;  %v705_v42 = vld [vmem:[#allocation2 + $0x1550] sm:$0xff]  ;;  %v706_v43 = vld [vmem:[#allocation2 + $0x1558] sm:$0xff]  ;;  %1473 = vst [vmem:[#allocation5 + $0x1548] sm:$0xff] %v704_v41 }
 0x169   :  { %1474 = vst [vmem:[#allocation5 + $0x1550] sm:$0xff] %v705_v42  ;;  %1475 = vst.msk [vmem:[#allocation5 + $0x1558] sm:$0xff] %vm793_vm0, %v706_v43  ;;  %v707_v44 = vld [vmem:[#allocation2 + $0x1560] sm:$0xff]  ;;  %v708_v45 = vld [vmem:[#allocation2 + $0x1568] sm:$0xff] }
 0x16a   :  { %v709_v46 = vld [vmem:[#allocation2 + $0x1570] sm:$0xff]  ;;  %1476 = vst [vmem:[#allocation5 + $0x1560] sm:$0xff] %v707_v44  ;;  %1477 = vst [vmem:[#allocation5 + $0x1568] sm:$0xff] %v708_v45  ;;  %v710_v47 = vld [vmem:[#allocation2 + $0x1578] sm:$0xff] }
 0x16b   :  { %1478 = vst.msk [vmem:[#allocation5 + $0x1570] sm:$0xff] %vm793_vm0, %v709_v46  ;;  %v711_v48 = vld [vmem:[#allocation2 + $0x1580] sm:$0xff]  ;;  %v712_v49 = vld [vmem:[#allocation2 + $0x1588] sm:$0xff]  ;;  %1479 = vst [vmem:[#allocation5 + $0x1578] sm:$0xff] %v710_v47 }
 0x16c   :  { %1480 = vst [vmem:[#allocation5 + $0x1580] sm:$0xff] %v711_v48  ;;  %1481 = vst.msk [vmem:[#allocation5 + $0x1588] sm:$0xff] %vm793_vm0, %v712_v49  ;;  %v713_v50 = vld [vmem:[#allocation2 + $0x1590] sm:$0xff]  ;;  %v714_v51 = vld [vmem:[#allocation2 + $0x1598] sm:$0xff] }
 0x16d   :  { %v715_v52 = vld [vmem:[#allocation2 + $0x15a0] sm:$0xff]  ;;  %1482 = vst [vmem:[#allocation5 + $0x1590] sm:$0xff] %v713_v50  ;;  %1483 = vst [vmem:[#allocation5 + $0x1598] sm:$0xff] %v714_v51  ;;  %v716_v53 = vld [vmem:[#allocation2 + $0x15a8] sm:$0xff] }
 0x16e   :  { %1484 = vst.msk [vmem:[#allocation5 + $0x15a0] sm:$0xff] %vm793_vm0, %v715_v52  ;;  %v717_v54 = vld [vmem:[#allocation2 + $0x15b0] sm:$0xff]  ;;  %v718_v55 = vld [vmem:[#allocation2 + $0x15b8] sm:$0xff]  ;;  %1485 = vst [vmem:[#allocation5 + $0x15a8] sm:$0xff] %v716_v53 }
 0x16f   :  { %1486 = vst [vmem:[#allocation5 + $0x15b0] sm:$0xff] %v717_v54  ;;  %1487 = vst.msk [vmem:[#allocation5 + $0x15b8] sm:$0xff] %vm793_vm0, %v718_v55  ;;  %v719_v56 = vld [vmem:[#allocation2 + $0x15c0] sm:$0xff]  ;;  %v720_v57 = vld [vmem:[#allocation2 + $0x15c8] sm:$0xff] }
 0x170   :  { %v721_v58 = vld [vmem:[#allocation2 + $0x15d0] sm:$0xff]  ;;  %1488 = vst [vmem:[#allocation5 + $0x15c0] sm:$0xff] %v719_v56  ;;  %1489 = vst [vmem:[#allocation5 + $0x15c8] sm:$0xff] %v720_v57  ;;  %v722_v59 = vld [vmem:[#allocation2 + $0x15d8] sm:$0xff] }
 0x171   :  { %1490 = vst.msk [vmem:[#allocation5 + $0x15d0] sm:$0xff] %vm793_vm0, %v721_v58  ;;  %v723_v60 = vld [vmem:[#allocation2 + $0x15e0] sm:$0xff]  ;;  %v724_v61 = vld [vmem:[#allocation2 + $0x15e8] sm:$0xff]  ;;  %1491 = vst [vmem:[#allocation5 + $0x15d8] sm:$0xff] %v722_v59 }
 0x172   :  { %1492 = vst [vmem:[#allocation5 + $0x15e0] sm:$0xff] %v723_v60  ;;  %1493 = vst.msk [vmem:[#allocation5 + $0x15e8] sm:$0xff] %vm793_vm0, %v724_v61  ;;  %v725_v62 = vld [vmem:[#allocation2 + $0x15f0] sm:$0xff]  ;;  %v726_v63 = vld [vmem:[#allocation2 + $0x15f8] sm:$0xff] }
 0x173   :  { %v727_v0 = vld [vmem:[#allocation2 + $0x1600] sm:$0xff]  ;;  %1494 = vst [vmem:[#allocation5 + $0x15f0] sm:$0xff] %v725_v62  ;;  %1495 = vst [vmem:[#allocation5 + $0x15f8] sm:$0xff] %v726_v63  ;;  %v728_v1 = vld [vmem:[#allocation2 + $0x1608] sm:$0xff] }
 0x174   :  { %1496 = vst.msk [vmem:[#allocation5 + $0x1600] sm:$0xff] %vm793_vm0, %v727_v0  ;;  %v729_v2 = vld [vmem:[#allocation2 + $0x1610] sm:$0xff]  ;;  %v730_v3 = vld [vmem:[#allocation2 + $0x1618] sm:$0xff]  ;;  %1497 = vst [vmem:[#allocation5 + $0x1608] sm:$0xff] %v728_v1 }
 0x175   :  { %1498 = vst [vmem:[#allocation5 + $0x1610] sm:$0xff] %v729_v2  ;;  %1499 = vst.msk [vmem:[#allocation5 + $0x1618] sm:$0xff] %vm793_vm0, %v730_v3  ;;  %v731_v4 = vld [vmem:[#allocation2 + $0x1620] sm:$0xff]  ;;  %v732_v5 = vld [vmem:[#allocation2 + $0x1628] sm:$0xff] }
 0x176   :  { %v733_v6 = vld [vmem:[#allocation2 + $0x1630] sm:$0xff]  ;;  %1500 = vst [vmem:[#allocation5 + $0x1620] sm:$0xff] %v731_v4  ;;  %1501 = vst [vmem:[#allocation5 + $0x1628] sm:$0xff] %v732_v5  ;;  %v734_v7 = vld [vmem:[#allocation2 + $0x1638] sm:$0xff] }
 0x177   :  { %1502 = vst.msk [vmem:[#allocation5 + $0x1630] sm:$0xff] %vm793_vm0, %v733_v6  ;;  %v735_v8 = vld [vmem:[#allocation2 + $0x1640] sm:$0xff]  ;;  %v736_v9 = vld [vmem:[#allocation2 + $0x1648] sm:$0xff]  ;;  %1503 = vst [vmem:[#allocation5 + $0x1638] sm:$0xff] %v734_v7 }
 0x178   :  { %1504 = vst [vmem:[#allocation5 + $0x1640] sm:$0xff] %v735_v8  ;;  %1505 = vst.msk [vmem:[#allocation5 + $0x1648] sm:$0xff] %vm793_vm0, %v736_v9  ;;  %v737_v10 = vld [vmem:[#allocation2 + $0x1650] sm:$0xff]  ;;  %v738_v11 = vld [vmem:[#allocation2 + $0x1658] sm:$0xff] }
 0x179   :  { %v739_v12 = vld [vmem:[#allocation2 + $0x1660] sm:$0xff]  ;;  %1506 = vst [vmem:[#allocation5 + $0x1650] sm:$0xff] %v737_v10  ;;  %1507 = vst [vmem:[#allocation5 + $0x1658] sm:$0xff] %v738_v11  ;;  %v740_v13 = vld [vmem:[#allocation2 + $0x1668] sm:$0xff] }
 0x17a   :  { %1508 = vst.msk [vmem:[#allocation5 + $0x1660] sm:$0xff] %vm793_vm0, %v739_v12  ;;  %v741_v14 = vld [vmem:[#allocation2 + $0x1670] sm:$0xff]  ;;  %v742_v15 = vld [vmem:[#allocation2 + $0x1678] sm:$0xff]  ;;  %1509 = vst [vmem:[#allocation5 + $0x1668] sm:$0xff] %v740_v13 }
 0x17b   :  { %1510 = vst [vmem:[#allocation5 + $0x1670] sm:$0xff] %v741_v14  ;;  %1511 = vst.msk [vmem:[#allocation5 + $0x1678] sm:$0xff] %vm793_vm0, %v742_v15  ;;  %v743_v16 = vld [vmem:[#allocation2 + $0x1680] sm:$0xff]  ;;  %v744_v17 = vld [vmem:[#allocation2 + $0x1688] sm:$0xff] }
 0x17c   :  { %v745_v18 = vld [vmem:[#allocation2 + $0x1690] sm:$0xff]  ;;  %1512 = vst [vmem:[#allocation5 + $0x1680] sm:$0xff] %v743_v16  ;;  %1513 = vst [vmem:[#allocation5 + $0x1688] sm:$0xff] %v744_v17  ;;  %v746_v19 = vld [vmem:[#allocation2 + $0x1698] sm:$0xff] }
 0x17d   :  { %1514 = vst.msk [vmem:[#allocation5 + $0x1690] sm:$0xff] %vm793_vm0, %v745_v18  ;;  %v747_v20 = vld [vmem:[#allocation2 + $0x16a0] sm:$0xff]  ;;  %v748_v21 = vld [vmem:[#allocation2 + $0x16a8] sm:$0xff]  ;;  %1515 = vst [vmem:[#allocation5 + $0x1698] sm:$0xff] %v746_v19 }
 0x17e   :  { %1516 = vst [vmem:[#allocation5 + $0x16a0] sm:$0xff] %v747_v20  ;;  %1517 = vst.msk [vmem:[#allocation5 + $0x16a8] sm:$0xff] %vm793_vm0, %v748_v21  ;;  %v749_v22 = vld [vmem:[#allocation2 + $0x16b0] sm:$0xff]  ;;  %v750_v23 = vld [vmem:[#allocation2 + $0x16b8] sm:$0xff] }
 0x17f   :  { %v751_v24 = vld [vmem:[#allocation2 + $0x16c0] sm:$0xff]  ;;  %1518 = vst [vmem:[#allocation5 + $0x16b0] sm:$0xff] %v749_v22  ;;  %1519 = vst [vmem:[#allocation5 + $0x16b8] sm:$0xff] %v750_v23  ;;  %v752_v25 = vld [vmem:[#allocation2 + $0x16c8] sm:$0xff] }
 0x180   :  { %1520 = vst.msk [vmem:[#allocation5 + $0x16c0] sm:$0xff] %vm793_vm0, %v751_v24  ;;  %v753_v26 = vld [vmem:[#allocation2 + $0x16d0] sm:$0xff]  ;;  %v754_v27 = vld [vmem:[#allocation2 + $0x16d8] sm:$0xff]  ;;  %1521 = vst [vmem:[#allocation5 + $0x16c8] sm:$0xff] %v752_v25 }
 0x181   :  { %1522 = vst [vmem:[#allocation5 + $0x16d0] sm:$0xff] %v753_v26  ;;  %1523 = vst.msk [vmem:[#allocation5 + $0x16d8] sm:$0xff] %vm793_vm0, %v754_v27  ;;  %v755_v28 = vld [vmem:[#allocation2 + $0x16e0] sm:$0xff]  ;;  %v756_v29 = vld [vmem:[#allocation2 + $0x16e8] sm:$0xff] }
 0x182   :  { %v757_v30 = vld [vmem:[#allocation2 + $0x16f0] sm:$0xff]  ;;  %1524 = vst [vmem:[#allocation5 + $0x16e0] sm:$0xff] %v755_v28  ;;  %1525 = vst [vmem:[#allocation5 + $0x16e8] sm:$0xff] %v756_v29  ;;  %v758_v31 = vld [vmem:[#allocation2 + $0x16f8] sm:$0xff] }
 0x183   :  { %1526 = vst.msk [vmem:[#allocation5 + $0x16f0] sm:$0xff] %vm793_vm0, %v757_v30  ;;  %v759_v32 = vld [vmem:[#allocation2 + $0x1700] sm:$0xff]  ;;  %v760_v33 = vld [vmem:[#allocation2 + $0x1708] sm:$0xff]  ;;  %1527 = vst [vmem:[#allocation5 + $0x16f8] sm:$0xff] %v758_v31 }
 0x184   :  { %1528 = vst [vmem:[#allocation5 + $0x1700] sm:$0xff] %v759_v32  ;;  %1529 = vst.msk [vmem:[#allocation5 + $0x1708] sm:$0xff] %vm793_vm0, %v760_v33  ;;  %v761_v34 = vld [vmem:[#allocation2 + $0x1710] sm:$0xff]  ;;  %v762_v35 = vld [vmem:[#allocation2 + $0x1718] sm:$0xff] }
 0x185   :  { %v763_v36 = vld [vmem:[#allocation2 + $0x1720] sm:$0xff]  ;;  %1530 = vst [vmem:[#allocation5 + $0x1710] sm:$0xff] %v761_v34  ;;  %1531 = vst [vmem:[#allocation5 + $0x1718] sm:$0xff] %v762_v35  ;;  %v764_v37 = vld [vmem:[#allocation2 + $0x1728] sm:$0xff] }
 0x186   :  { %1532 = vst.msk [vmem:[#allocation5 + $0x1720] sm:$0xff] %vm793_vm0, %v763_v36  ;;  %v765_v38 = vld [vmem:[#allocation2 + $0x1730] sm:$0xff]  ;;  %v766_v39 = vld [vmem:[#allocation2 + $0x1738] sm:$0xff]  ;;  %1533 = vst [vmem:[#allocation5 + $0x1728] sm:$0xff] %v764_v37 }
 0x187   :  { %1534 = vst [vmem:[#allocation5 + $0x1730] sm:$0xff] %v765_v38  ;;  %1535 = vst.msk [vmem:[#allocation5 + $0x1738] sm:$0xff] %vm793_vm0, %v766_v39  ;;  %v767_v40 = vld [vmem:[#allocation2 + $0x1740] sm:$0xff]  ;;  %v768_v41 = vld [vmem:[#allocation2 + $0x1748] sm:$0xff] }
 0x188   :  { %v769_v42 = vld [vmem:[#allocation2 + $0x1750] sm:$0xff]  ;;  %1536 = vst [vmem:[#allocation5 + $0x1740] sm:$0xff] %v767_v40  ;;  %1537 = vst [vmem:[#allocation5 + $0x1748] sm:$0xff] %v768_v41  ;;  %v770_v43 = vld [vmem:[#allocation2 + $0x1758] sm:$0xff] }
 0x189   :  { %1538 = vst.msk [vmem:[#allocation5 + $0x1750] sm:$0xff] %vm793_vm0, %v769_v42  ;;  %v771_v44 = vld [vmem:[#allocation2 + $0x1760] sm:$0xff]  ;;  %v772_v45 = vld [vmem:[#allocation2 + $0x1768] sm:$0xff]  ;;  %1539 = vst [vmem:[#allocation5 + $0x1758] sm:$0xff] %v770_v43 }
 0x18a   :  { %1540 = vst [vmem:[#allocation5 + $0x1760] sm:$0xff] %v771_v44  ;;  %1541 = vst.msk [vmem:[#allocation5 + $0x1768] sm:$0xff] %vm793_vm0, %v772_v45  ;;  %v773_v46 = vld [vmem:[#allocation2 + $0x1770] sm:$0xff]  ;;  %v774_v47 = vld [vmem:[#allocation2 + $0x1778] sm:$0xff] }
 0x18b   :  { %v775_v48 = vld [vmem:[#allocation2 + $0x1780] sm:$0xff]  ;;  %1542 = vst [vmem:[#allocation5 + $0x1770] sm:$0xff] %v773_v46  ;;  %1543 = vst [vmem:[#allocation5 + $0x1778] sm:$0xff] %v774_v47  ;;  %v776_v49 = vld [vmem:[#allocation2 + $0x1788] sm:$0xff] }
 0x18c   :  { %1544 = vst.msk [vmem:[#allocation5 + $0x1780] sm:$0xff] %vm793_vm0, %v775_v48  ;;  %v777_v50 = vld [vmem:[#allocation2 + $0x1790] sm:$0xff]  ;;  %v778_v51 = vld [vmem:[#allocation2 + $0x1798] sm:$0xff]  ;;  %1545 = vst [vmem:[#allocation5 + $0x1788] sm:$0xff] %v776_v49 }
 0x18d   :  { %1546 = vst [vmem:[#allocation5 + $0x1790] sm:$0xff] %v777_v50  ;;  %1547 = vst.msk [vmem:[#allocation5 + $0x1798] sm:$0xff] %vm793_vm0, %v778_v51  ;;  %v779_v52 = vld [vmem:[#allocation2 + $0x17a0] sm:$0xff]  ;;  %v780_v53 = vld [vmem:[#allocation2 + $0x17a8] sm:$0xff] }
 0x18e   :  { %v781_v54 = vld [vmem:[#allocation2 + $0x17b0] sm:$0xff]  ;;  %1548 = vst [vmem:[#allocation5 + $0x17a0] sm:$0xff] %v779_v52  ;;  %1549 = vst [vmem:[#allocation5 + $0x17a8] sm:$0xff] %v780_v53  ;;  %v782_v55 = vld [vmem:[#allocation2 + $0x17b8] sm:$0xff] }
 0x18f   :  { %1550 = vst.msk [vmem:[#allocation5 + $0x17b0] sm:$0xff] %vm793_vm0, %v781_v54  ;;  %v783_v56 = vld [vmem:[#allocation2 + $0x17c0] sm:$0xff]  ;;  %v784_v57 = vld [vmem:[#allocation2 + $0x17c8] sm:$0xff]  ;;  %1551 = vst [vmem:[#allocation5 + $0x17b8] sm:$0xff] %v782_v55 }
 0x190   :  { %1552 = vst [vmem:[#allocation5 + $0x17c0] sm:$0xff] %v783_v56  ;;  %1553 = vst.msk [vmem:[#allocation5 + $0x17c8] sm:$0xff] %vm793_vm0, %v784_v57  ;;  %v785_v58 = vld [vmem:[#allocation2 + $0x17d0] sm:$0xff]  ;;  %v786_v59 = vld [vmem:[#allocation2 + $0x17d8] sm:$0xff] }
 0x191   :  { %v787_v60 = vld [vmem:[#allocation2 + $0x17e0] sm:$0xff]  ;;  %1554 = vst [vmem:[#allocation5 + $0x17d0] sm:$0xff] %v785_v58  ;;  %1555 = vst [vmem:[#allocation5 + $0x17d8] sm:$0xff] %v786_v59  ;;  %v788_v61 = vld [vmem:[#allocation2 + $0x17e8] sm:$0xff] }
 0x192   :  { %1556 = vst.msk [vmem:[#allocation5 + $0x17e0] sm:$0xff] %vm793_vm0, %v787_v60  ;;  %v789_v62 = vld [vmem:[#allocation2 + $0x17f0] sm:$0xff]  ;;  %v790_v63 = vld [vmem:[#allocation2 + $0x17f8] sm:$0xff]  ;;  %1557 = vst [vmem:[#allocation5 + $0x17e8] sm:$0xff] %v788_v61 }
 0x193   :  { %1558 = vst [vmem:[#allocation5 + $0x17f0] sm:$0xff] %v789_v62  ;;  %1559 = vst.msk [vmem:[#allocation5 + $0x17f8] sm:$0xff] %vm793_vm0, %v790_v63 }
 0x194   :  { %1614 = shalt.err (!%p1611_p12)
}
 0x195   :  { %s1615_s24 = scalar_lea.hbm %s1930_s1, 98304 }
 0x196   :  { %p1616_p13 = scmp.ne.s32.totalorder %s1930_s1, %s1615_s24  ;;  %p1619_p0 = scmp.lt.u32.totalorder %s1615_s24, %s1930_s1 }
 0x198   :  { %p1621_p1 = pnand %p1619_p0, %p1616_p13 }
 0x19a   :  { %1624 = shalt.err (!%p1621_p1)
}
 0x19b   :  { %1571 = dma.vmem_to_hbm [thread:$0]  %s1566_s20, 98304, %s1930_s1, [#allocation4], %s1630_s16, %s1630_s16, %s1631_s17  }
 0x19c   :  { %1627 = dma.done.wait [#allocation4], 98304  }
 0x19d   :  { %1628 = vsyncadd [#allocation4], 4294868992 }
 0x19e   :  { %1575 = vsyncpa [#allocation3], 1 }
 0x19f   :  { %1576 = vsyncpa [#allocation4], 1 }

</bundles_post_ra>
